<compile_context>
chip_gen: v7x
topology: tpu7x:2x2x1
jax: 0.10.0
libtpu: 0.0.40
codegen_flags: <defaults>
</compile_context>

<pallas_src>
import functools
import math

import numpy as np
import jax
import jax.numpy as jnp
from jax.experimental import pallas as pl
from jax.experimental.pallas import tpu as pltpu

LANE = 128


def _round_up(x, m):
    return ((x + m - 1) // m) * m


# ----------------------------------------------------------------------------
# Fused kernel: static linear + LSTM recurrence, grid = (batch tiles, T chunks)
# ----------------------------------------------------------------------------
def _fused_kernel(sta_ref, temp_ref, emb_w_ref, emb_b_ref,
                  wih_ref, whh_ref, b_ref,
                  out_sta_ref, out_h_ref,
                  h_ref, c_ref, gx_ref,
                  *, true_T, mask_tail):
    """sta_ref    : (B_tile, F_sta)        bf16
       temp_ref   : (Tc, B_tile, D)        bf16  (time-major chunk)
       emb_w_ref  : (F_sta, Hsp) bf16, emb_b_ref : (1, Hsp) f32
       wih_ref    : (D, 4*Hp) bf16  (temporal embedding already folded in)
       whh_ref    : (Hp, 4*Hp) bf16, b_ref : (1, 4*Hp) f32
       out_sta_ref: (B_tile, Hsp) f32, out_h_ref : (B_tile, Hp) f32
       h_ref,c_ref: (B_tile, Hp) f32 scratch  (LSTM state, persists across Tc chunks)
       gx_ref     : (Tc*B_tile, 4*Hp) f32 scratch (per-chunk pre-gates)
       Gates live in four Hp-wide, 128-lane-aligned slabs [i | f | g | o].
    """
    Tc, B_tile, D = temp_ref.shape
    Hp = h_ref.shape[1]
    t_chunk = pl.program_id(1)
    n_chunks = pl.num_programs(1)

    @pl.when(t_chunk == 0)
    def _init():
        # Reset the recurrent state for this batch tile.
        h_ref[...] = jnp.zeros_like(h_ref)
        c_ref[...] = jnp.zeros_like(c_ref)
        # Static branch: one bf16 MXU push, f32 accumulate, lane-dense store.
        out_sta_ref[...] = (
            jnp.dot(sta_ref[...], emb_w_ref[...],
                    preferred_element_type=jnp.float32)
            + emb_b_ref[...])

    # Hoisted input projection for this T-chunk: one (Tc*B_tile, D) @ (D, 4Hp)
    # bf16 MXU matmul into VMEM scratch (layout-preserving reshape: B_tile%8==0).
    x2d = temp_ref[...].reshape(Tc * B_tile, D)
    gx_ref[...] = (
        jnp.dot(x2d, wih_ref[...], preferred_element_type=jnp.float32)
        + b_ref[...])

    def step(i, carry):
        h, c = carry
        row = pl.multiple_of(i * B_tile, B_tile)
        g = gx_ref[pl.ds(row, B_tile), :] + jnp.dot(
            h.astype(whh_ref.dtype), whh_ref[...],
            preferred_element_type=jnp.float32)
        i_g = jax.nn.sigmoid(g[:, 0 * Hp:1 * Hp])
        f_g = jax.nn.sigmoid(g[:, 1 * Hp:2 * Hp])
        g_g = jnp.tanh(g[:, 2 * Hp:3 * Hp])
        o_g = jax.nn.sigmoid(g[:, 3 * Hp:4 * Hp])
        c_new = f_g * c + i_g * g_g
        h_new = o_g * jnp.tanh(c_new)
        if mask_tail:
            # Skip zero-padded timesteps beyond the true sequence length.
            valid = (t_chunk * Tc + i) < true_T
            h_new = jnp.where(valid, h_new, h)
            c_new = jnp.where(valid, c_new, c)
        return h_new, c_new

    h, c = jax.lax.fori_loop(0, Tc, step, (h_ref[...], c_ref[...]),
                             unroll=True if Tc <= 16 else 8)
    h_ref[...] = h
    c_ref[...] = c

    @pl.when(t_chunk == n_chunks - 1)
    def _finalize():
        out_h_ref[...] = h   # lane-dense (Hp = multiple of 128) store


# ----------------------------------------------------------------------------
# Parameter init (matches the module's parameter shapes; PyTorch-like uniform)
# ----------------------------------------------------------------------------
def init_params(key, n_feature_sta, n_feature_temp, n_hidden_sta,
                n_hidden_temp, n_embedding_temp=None):
    keys = jax.random.split(key, 8)
    params = {}

    def u(k, shape, fan):
        bound = 1.0 / math.sqrt(fan)
        return jax.random.uniform(k, shape, jnp.float32, -bound, bound)

    # emb: Linear(n_feature_sta, n_hidden_sta), stored as (in, out)
    params["emb_w"] = u(keys[0], (n_feature_sta, n_hidden_sta), n_feature_sta)
    params["emb_b"] = u(keys[1], (n_hidden_sta,), n_feature_sta)

    rnn_in = n_feature_temp
    if n_embedding_temp:   # note: n_embedding_temp == 0 behaves like None
        params["temp_emb_w"] = u(
            keys[2], (n_feature_temp, n_embedding_temp), n_feature_temp)
        params["temp_emb_b"] = u(keys[3], (n_embedding_temp,), n_feature_temp)
        rnn_in = n_embedding_temp

    # LSTM(rnn_in, n_hidden_temp), single layer, gate order [i, f, g, o]
    H = n_hidden_temp
    params["w_ih"] = u(keys[4], (rnn_in, 4 * H), H)   # (D, 4H)
    params["w_hh"] = u(keys[5], (H, 4 * H), H)        # (H, 4H)
    # PyTorch has b_ih and b_hh; they are only ever summed, so keep the sum.
    params["b"] = u(keys[6], (4 * H,), H) + u(keys[7], (4 * H,), H)
    return params


# ----------------------------------------------------------------------------
# One-time preprocessing: fold temporal embedding, lane-pad gates, cast to bf16
# ----------------------------------------------------------------------------
def prepare_params(params, n_embedding_temp=None):
    Hs = params["emb_w"].shape[1]
    H = params["w_hh"].shape[0]
    Hsp = _round_up(Hs, LANE)
    Hp = _round_up(H, LANE)

    # Fold the optional temporal embedding into the LSTM input weights:
    #   (x We + be) Wih + b  ==  x (We Wih) + (be Wih + b)
    if n_embedding_temp:
        w_ih = params["temp_emb_w"] @ params["w_ih"]            # (D, 4H)
        b = params["temp_emb_b"] @ params["w_ih"] + params["b"]
    else:
        w_ih = params["w_ih"]
        b = params["b"]
    D = w_ih.shape[0]

    # Scatter each gate's H columns into an Hp-wide, 128-lane-aligned slab so
    # all in-kernel gate slices are lane-aligned. Zero padding keeps the padded
    # hidden lanes identically zero through the recurrence (g=tanh(0)=0, c=0).
    def pad_gate_cols(w):                  # (rows, 4H) -> (rows, 4Hp)
        out = jnp.zeros((w.shape[0], 4 * Hp), jnp.float32)
        for k in range(4):
            out = out.at[:, k * Hp:k * Hp + H].set(w[:, k * H:(k + 1) * H])
        return out

    w_ih_p = pad_gate_cols(w_ih)                                   # (D, 4Hp)
    w_hh_p = jnp.zeros((Hp, 4 * Hp), jnp.float32)
    w_hh_p = w_hh_p.at[:H].set(pad_gate_cols(params["w_hh"]))      # (Hp, 4Hp)
    b_p = pad_gate_cols(b[None, :])                                # (1, 4Hp)

    emb_w_p = jnp.zeros((params["emb_w"].shape[0], Hsp), jnp.float32)
    emb_w_p = emb_w_p.at[:, :Hs].set(params["emb_w"])
    emb_b_p = jnp.zeros((1, Hsp), jnp.float32).at[0, :Hs].set(params["emb_b"])

    return {
        "emb_w": emb_w_p.astype(jnp.bfloat16),   # MXU operands in bf16
        "emb_b": emb_b_p,                        # biases stay f32
        "w_ih": w_ih_p.astype(jnp.bfloat16),
        "w_hh": w_hh_p.astype(jnp.bfloat16),
        "b": b_p,
        "dims": {"Hs": Hs, "H": H, "Hsp": Hsp, "Hp": Hp, "D": D},
    }


def _vmem_limit_bytes(B_tile, Tc, D, F_sta, Hsp, Hp):
    bf16, f32, dbl = 2, 4, 2
    inputs = dbl * (B_tile * F_sta * bf16 + Tc * B_tile * D * bf16
                    + F_sta * Hsp * bf16 + Hsp * f32
                    + D * 4 * Hp * bf16 + Hp * 4 * Hp * bf16 + 4 * Hp * f32)
    outputs = dbl * (B_tile * Hsp + B_tile * Hp) * f32
    scratch = (2 * B_tile * Hp + Tc * B_tile * 4 * Hp) * f32
    est = int(1.5 * (inputs + outputs + scratch)) + (2 << 20)
    return min(max(est, 8 << 20), 64 << 20)   # safe cap across v5e/v6e/v7x


# ----------------------------------------------------------------------------
# SequenceFeature forward (single fused pallas_call)
# ----------------------------------------------------------------------------
def sequence_feature_forward(prepped, x):
    # TODO(synk): GRU variant (model='gru') not implemented; this covers 'lstm'.
    sta, temp = x
    B, T, _ = temp.shape
    F_sta = sta.shape[1]
    d = prepped["dims"]
    Hs, H, Hsp, Hp, D = d["Hs"], d["H"], d["Hsp"], d["Hp"], d["D"]

    # --- tiling ---
    B_tile = min(256, _round_up(B, 8))          # >=8 sublanes, big enough for MXU
    B_pad = _round_up(B, B_tile)
    # Chunk T so the per-chunk f32 pre-gate scratch stays within a few MiB
    # (re-derived per shapes; fits v7x's 64 MiB physical VMEM with headroom).
    gates_budget = 4 << 20
    per_step = B_tile * 4 * Hp * 4
    steps_in_budget = max(8, (gates_budget // per_step) // 8 * 8)
    Tc = int(min(_round_up(T, 8), steps_in_budget))
    T_pad = _round_up(T, Tc)
    mask_tail = (T_pad != T)

    # Single fused preprocessing copy: time-major + batch/time zero-pad + bf16
    # cast (the pad + cast is needed anyway, so this adds no extra HBM trip).
    temp_t = jnp.transpose(temp, (1, 0, 2))                       # (T, B, D)
    temp_t = jnp.pad(temp_t, ((0, T_pad - T), (0, B_pad - B), (0, 0)))
    temp_t = temp_t.astype(jnp.bfloat16)                          # (T_pad, B_pad, D)
    sta_p = jnp.pad(sta, ((0, B_pad - B), (0, 0))).astype(jnp.bfloat16)

    nb, nt = B_pad // B_tile, T_pad // Tc
    kernel = functools.partial(_fused_kernel, true_T=T, mask_tail=mask_tail)

    out_sta, out_h = pl.pallas_call(
        kernel,
        out_shape=(jax.ShapeDtypeStruct((B_pad, Hsp), jnp.float32),
                   jax.ShapeDtypeStruct((B_pad, Hp), jnp.float32)),
        grid=(nb, nt),
        in_specs=[
            pl.BlockSpec((B_tile, F_sta), lambda b, t: (b, 0)),
            pl.BlockSpec((Tc, B_tile, D), lambda b, t: (t, b, 0)),
            # Weights pinned at block (0, 0): stay VMEM-resident across tiles.
            pl.BlockSpec((F_sta, Hsp), lambda b, t: (0, 0)),
            pl.BlockSpec((1, Hsp), lambda b, t: (0, 0)),
            pl.BlockSpec((D, 4 * Hp), lambda b, t: (0, 0)),
            pl.BlockSpec((Hp, 4 * Hp), lambda b, t: (0, 0)),
            pl.BlockSpec((1, 4 * Hp), lambda b, t: (0, 0)),
        ],
        out_specs=[
            pl.BlockSpec((B_tile, Hsp), lambda b, t: (b, 0)),
            pl.BlockSpec((B_tile, Hp), lambda b, t: (b, 0)),
        ],
        scratch_shapes=[
            pltpu.VMEM((B_tile, Hp), jnp.float32),            # h state
            pltpu.VMEM((B_tile, Hp), jnp.float32),            # c state
            pltpu.VMEM((Tc * B_tile, 4 * Hp), jnp.float32),   # per-chunk gates
        ],
        compiler_params=pltpu.CompilerParams(
            dimension_semantics=("parallel", "arbitrary"),
            vmem_limit_bytes=_vmem_limit_bytes(B_tile, Tc, D, F_sta, Hsp, Hp)),
    )(sta_p, temp_t, prepped["emb_w"], prepped["emb_b"],
      prepped["w_ih"], prepped["w_hh"], prepped["b"])

    # Strip lane/batch padding and concatenate outside the kernel.
    return jnp.concatenate([out_sta[:B, :Hs], out_h[:B, :H]], axis=1)


# ----------------------------------------------------------------------------
# Pure-JAX f32 reference (unfused, unfolded) for a sanity check
# ----------------------------------------------------------------------------
def _reference_forward(params, x, n_embedding_temp=None):
    sta, temp = x
    repr_sta = sta @ params["emb_w"] + params["emb_b"]
    if n_embedding_temp:
        temp = temp @ params["temp_emb_w"] + params["temp_emb_b"]
    B, T, _ = temp.shape
    H = params["w_hh"].shape[0]

    def step(carry, x_t):
        h, c = carry
        gates = x_t @ params["w_ih"] + h @ params["w_hh"] + params["b"]
        i = jax.nn.sigmoid(gates[:, 0 * H:1 * H])
        f = jax.nn.sigmoid(gates[:, 1 * H:2 * H])
        g = jnp.tanh(gates[:, 2 * H:3 * H])
        o = jax.nn.sigmoid(gates[:, 3 * H:4 * H])
        c = f * c + i * g
        h = o * jnp.tanh(c)
        return (h, c), None

    h0 = jnp.zeros((B, H), jnp.float32)
    (h, _), _ = jax.lax.scan(step, (h0, h0), jnp.swapaxes(temp, 0, 1))
    return jnp.concatenate([repr_sta, h], axis=1)


if __name__ == "__main__":
    # small shapes: batch=2, seq=8, static feat=4, temporal feat=6,
    # hidden_sta=8, hidden_temp=16, temporal embedding=16
    B, T = 2, 8
    n_feature_sta, n_feature_temp = 4, 6
    n_hidden_sta, n_hidden_temp = 8, 16
    n_embedding_temp = 16

    key = jax.random.PRNGKey(0)
    k_sta, k_temp, k_params = jax.random.split(key, 3)
    sta = jax.random.normal(k_sta, (B, n_feature_sta), jnp.float32)
    temp = jax.random.normal(k_temp, (B, T, n_feature_temp), jnp.float32)

    params = init_params(k_params, n_feature_sta, n_feature_temp,
                         n_hidden_sta, n_hidden_temp, n_embedding_temp)
    prepped = prepare_params(params, n_embedding_temp)   # fold+pad+cast ONCE

    out = sequence_feature_forward(prepped, (sta, temp))
    out = jax.block_until_ready(out)

    ref = _reference_forward(params, (sta, temp), n_embedding_temp)
    assert out.shape == (B, n_hidden_sta + n_hidden_temp)
    # Tolerance is loosened vs the pure-f32 reference because MXU operands are
    # bf16 (accumulation, biases and gate math remain f32).
    np.testing.assert_allclose(np.asarray(out), np.asarray(ref),
                               rtol=7.5e-2, atol=7.5e-2)
    print("KERNEL_OK")
</pallas_src>

<mosaic_0001>
module attributes {stable_mosaic.version = 11 : i64} {
  func.func @_fused_kernel(%arg0: i32, %arg1: i32, %arg2: memref<8x4xbf16, #tpu.memory_space<vmem>>, %arg3: memref<8x8x6xbf16, #tpu.memory_space<vmem>>, %arg4: memref<4x128xbf16, #tpu.memory_space<vmem>>, %arg5: memref<1x128xf32, #tpu.memory_space<vmem>>, %arg6: memref<6x512xbf16, #tpu.memory_space<vmem>>, %arg7: memref<128x512xbf16, #tpu.memory_space<vmem>>, %arg8: memref<1x512xf32, #tpu.memory_space<vmem>>, %arg9: memref<8x128xf32, #tpu.memory_space<vmem>>, %arg10: memref<8x128xf32, #tpu.memory_space<vmem>>, %arg11: memref<8x128xf32, #tpu.memory_space<vmem>>, %arg12: memref<8x128xf32, #tpu.memory_space<vmem>>, %arg13: memref<64x512xf32, #tpu.memory_space<vmem>>) attributes {dimension_semantics = [#tpu.dimension_semantics<parallel>, #tpu.dimension_semantics<arbitrary>], iteration_bounds = array<i64: 1, 1>, scalar_prefetch = 0 : i64, scratch_operands = 3 : i64, tpu.core_type = #tpu.core_type<tc>, window_params = [{transform_indices = @transform_0, window_bounds = array<i64: 8, 4>}, {transform_indices = @transform_1, window_bounds = array<i64: 8, 8, 6>}, {pipeline_mode = #tpu.pipeline_mode<synchronous>, transform_indices = @transform_2, window_bounds = array<i64: 4, 128>}, {pipeline_mode = #tpu.pipeline_mode<synchronous>, transform_indices = @transform_3, window_bounds = array<i64: 1, 128>}, {pipeline_mode = #tpu.pipeline_mode<synchronous>, transform_indices = @transform_4, window_bounds = array<i64: 6, 512>}, {pipeline_mode = #tpu.pipeline_mode<synchronous>, transform_indices = @transform_5, window_bounds = array<i64: 128, 512>}, {pipeline_mode = #tpu.pipeline_mode<synchronous>, transform_indices = @transform_6, window_bounds = array<i64: 1, 512>}, {transform_indices = @transform_7, window_bounds = array<i64: 8, 128>}, {transform_indices = @transform_8, window_bounds = array<i64: 8, 128>}]} {
    %c0_i32 = arith.constant 0 : i32
    %0 = arith.cmpi eq, %arg1, %c0_i32 : i32
    %1 = arith.extui %0 : i1 to i32
    %c0_i32_0 = arith.constant 0 : i32
    %2 = arith.cmpi ne, %1, %c0_i32_0 : i32
    scf.if %2 {
      %cst_84 = arith.constant 0.000000e+00 : f32
      %282 = vector.broadcast %cst_84 : f32 to vector<8x128xf32>
      %c0_85 = arith.constant 0 : index
      %c0_86 = arith.constant 0 : index
      %283 = vector.load %arg11[%c0_85, %c0_86] : memref<8x128xf32, #tpu.memory_space<vmem>>, vector<8x128xf32>
      tpu.vector_store %arg11[%c0_85, %c0_86], %282 {strides = array<i32>} : memref<8x128xf32, #tpu.memory_space<vmem>>, vector<8x128xf32>,
      %cst_87 = arith.constant 0.000000e+00 : f32
      %284 = vector.broadcast %cst_87 : f32 to vector<8x128xf32>
      %c0_88 = arith.constant 0 : index
      %c0_89 = arith.constant 0 : index
      %285 = vector.load %arg12[%c0_88, %c0_89] : memref<8x128xf32, #tpu.memory_space<vmem>>, vector<8x128xf32>
      tpu.vector_store %arg12[%c0_88, %c0_89], %284 {strides = array<i32>} : memref<8x128xf32, #tpu.memory_space<vmem>>, vector<8x128xf32>,
      %c0_90 = arith.constant 0 : index
      %c0_91 = arith.constant 0 : index
      %286 = vector.load %arg2[%c0_90, %c0_91] : memref<8x4xbf16, #tpu.memory_space<vmem>>, vector<8x4xbf16>
      %c0_92 = arith.constant 0 : index
      %c0_93 = arith.constant 0 : index
      %287 = vector.load %arg4[%c0_92, %c0_93] : memref<4x128xbf16, #tpu.memory_space<vmem>>, vector<4x128xbf16>
      %cst_94 = arith.constant dense<0.000000e+00> : vector<8x128xf32>
      %288 = tpu.matmul %286, %287, %cst_94 {dimension_numbers = #tpu.dot_dimension_numbers<[1], [0], [0], [1], [0, 0, 1, 1], [], []>} : vector<8x4xbf16>, vector<4x128xbf16>, vector<8x128xf32> -> vector<8x128xf32>
      %c0_95 = arith.constant 0 : index
      %c0_96 = arith.constant 0 : index
      %289 = vector.load %arg5[%c0_95, %c0_96] : memref<1x128xf32, #tpu.memory_space<vmem>>, vector<1x128xf32>
      %290 = vector.broadcast %289 : vector<1x128xf32> to vector<8x128xf32>
      %291 = arith.addf %288, %290 : vector<8x128xf32>
      %c0_97 = arith.constant 0 : index
      %c0_98 = arith.constant 0 : index
      %292 = vector.load %arg9[%c0_97, %c0_98] : memref<8x128xf32, #tpu.memory_space<vmem>>, vector<8x128xf32>
      tpu.vector_store %arg9[%c0_97, %c0_98], %291 {strides = array<i32>} : memref<8x128xf32, #tpu.memory_space<vmem>>, vector<8x128xf32>,
    } else {
    }
    %c0 = arith.constant 0 : index
    %c0_1 = arith.constant 0 : index
    %c0_2 = arith.constant 0 : index
    %3 = vector.load %arg3[%c0, %c0_1, %c0_2] : memref<8x8x6xbf16, #tpu.memory_space<vmem>>, vector<8x8x6xbf16>
    %4 = vector.shape_cast %3 : vector<8x8x6xbf16> to vector<64x6xbf16>
    %c0_3 = arith.constant 0 : index
    %c0_4 = arith.constant 0 : index
    %5 = vector.load %arg6[%c0_3, %c0_4] : memref<6x512xbf16, #tpu.memory_space<vmem>>, vector<6x512xbf16>
    %cst = arith.constant dense<0.000000e+00> : vector<64x512xf32>
    %6 = tpu.matmul %4, %5, %cst {dimension_numbers = #tpu.dot_dimension_numbers<[1], [0], [0], [1], [0, 0, 1, 1], [], []>} : vector<64x6xbf16>, vector<6x512xbf16>, vector<64x512xf32> -> vector<64x512xf32>
    %c0_5 = arith.constant 0 : index
    %c0_6 = arith.constant 0 : index
    %7 = vector.load %arg8[%c0_5, %c0_6] : memref<1x512xf32, #tpu.memory_space<vmem>>, vector<1x512xf32>
    %8 = vector.broadcast %7 : vector<1x512xf32> to vector<64x512xf32>
    %9 = arith.addf %6, %8 : vector<64x512xf32>
    %c0_7 = arith.constant 0 : index
    %c0_8 = arith.constant 0 : index
    %10 = vector.load %arg13[%c0_7, %c0_8] : memref<64x512xf32, #tpu.memory_space<vmem>>, vector<64x512xf32>
    tpu.vector_store %arg13[%c0_7, %c0_8], %9 {strides = array<i32>} : memref<64x512xf32, #tpu.memory_space<vmem>>, vector<64x512xf32>,
    %c0_9 = arith.constant 0 : index
    %c0_10 = arith.constant 0 : index
    %11 = vector.load %arg11[%c0_9, %c0_10] : memref<8x128xf32, #tpu.memory_space<vmem>>, vector<8x128xf32>
    %c0_11 = arith.constant 0 : index
    %c0_12 = arith.constant 0 : index
    %12 = vector.load %arg12[%c0_11, %c0_12] : memref<8x128xf32, #tpu.memory_space<vmem>>, vector<8x128xf32>
    %c0_i32_13 = arith.constant 0 : i32
    %c8_i32 = arith.constant 8 : i32
    %13 = arith.muli %c0_i32_13, %c8_i32 : i32
    %14 = tpu.assume_multiple %13, 8 : i32
    %15 = arith.index_cast %14 : i32 to index
    %c0_14 = arith.constant 0 : index
    %16 = vector.load %arg13[%15, %c0_14] : memref<64x512xf32, #tpu.memory_space<vmem>>, vector<8x512xf32>
    %17 = arith.truncf %11 : vector<8x128xf32> to vector<8x128xbf16>
    %c0_15 = arith.constant 0 : index
    %c0_16 = arith.constant 0 : index
    %18 = vector.load %arg7[%c0_15, %c0_16] : memref<128x512xbf16, #tpu.memory_space<vmem>>, vector<128x512xbf16>
    %cst_17 = arith.constant dense<0.000000e+00> : vector<8x512xf32>
    %19 = tpu.matmul %17, %18, %cst_17 {dimension_numbers = #tpu.dot_dimension_numbers<[1], [0], [0], [1], [0, 0, 1, 1], [], []>} : vector<8x128xbf16>, vector<128x512xbf16>, vector<8x512xf32> -> vector<8x512xf32>
    %20 = arith.addf %16, %19 : vector<8x512xf32>
    %21 = vector.extract_strided_slice %20 {offsets = [0, 0], sizes = [8, 128], strides = [1, 1]} : vector<8x512xf32> to vector<8x128xf32>
    %22 = arith.negf %21 : vector<8x128xf32>
    %23 = math.exp %22 : vector<8x128xf32>
    %cst_18 = arith.constant 1.000000e+00 : f32
    %24 = vector.broadcast %cst_18 : f32 to vector<8x128xf32>
    %25 = arith.addf %24, %23 : vector<8x128xf32>
    %26 = arith.divf %24, %25 : vector<8x128xf32>
    %27 = vector.extract_strided_slice %20 {offsets = [0, 128], sizes = [8, 128], strides = [1, 1]} : vector<8x512xf32> to vector<8x128xf32>
    %28 = arith.negf %27 : vector<8x128xf32>
    %29 = math.exp %28 : vector<8x128xf32>
    %cst_19 = arith.constant 1.000000e+00 : f32
    %30 = vector.broadcast %cst_19 : f32 to vector<8x128xf32>
    %31 = arith.addf %30, %29 : vector<8x128xf32>
    %32 = arith.divf %30, %31 : vector<8x128xf32>
    %33 = vector.extract_strided_slice %20 {offsets = [0, 256], sizes = [8, 128], strides = [1, 1]} : vector<8x512xf32> to vector<8x128xf32>
    %34 = math.tanh %33 : vector<8x128xf32>
    %35 = vector.extract_strided_slice %20 {offsets = [0, 384], sizes = [8, 128], strides = [1, 1]} : vector<8x512xf32> to vector<8x128xf32>
    %36 = arith.negf %35 : vector<8x128xf32>
    %37 = math.exp %36 : vector<8x128xf32>
    %cst_20 = arith.constant 1.000000e+00 : f32
    %38 = vector.broadcast %cst_20 : f32 to vector<8x128xf32>
    %39 = arith.addf %38, %37 : vector<8x128xf32>
    %40 = arith.divf %38, %39 : vector<8x128xf32>
    %41 = arith.mulf %32, %12 : vector<8x128xf32>
    %42 = arith.mulf %26, %34 : vector<8x128xf32>
    %43 = arith.addf %41, %42 : vector<8x128xf32>
    %44 = math.tanh %43 : vector<8x128xf32>
    %45 = arith.mulf %40, %44 : vector<8x128xf32>
    %c1_i32 = arith.constant 1 : i32
    %c8_i32_21 = arith.constant 8 : i32
    %46 = arith.muli %c1_i32, %c8_i32_21 : i32
    %47 = tpu.assume_multiple %46, 8 : i32
    %48 = arith.index_cast %47 : i32 to index
    %c0_22 = arith.constant 0 : index
    %49 = vector.load %arg13[%48, %c0_22] : memref<64x512xf32, #tpu.memory_space<vmem>>, vector<8x512xf32>
    %50 = arith.truncf %45 : vector<8x128xf32> to vector<8x128xbf16>
    %c0_23 = arith.constant 0 : index
    %c0_24 = arith.constant 0 : index
    %51 = vector.load %arg7[%c0_23, %c0_24] : memref<128x512xbf16, #tpu.memory_space<vmem>>, vector<128x512xbf16>
    %cst_25 = arith.constant dense<0.000000e+00> : vector<8x512xf32>
    %52 = tpu.matmul %50, %51, %cst_25 {dimension_numbers = #tpu.dot_dimension_numbers<[1], [0], [0], [1], [0, 0, 1, 1], [], []>} : vector<8x128xbf16>, vector<128x512xbf16>, vector<8x512xf32> -> vector<8x512xf32>
    %53 = arith.addf %49, %52 : vector<8x512xf32>
    %54 = vector.extract_strided_slice %53 {offsets = [0, 0], sizes = [8, 128], strides = [1, 1]} : vector<8x512xf32> to vector<8x128xf32>
    %55 = arith.negf %54 : vector<8x128xf32>
    %56 = math.exp %55 : vector<8x128xf32>
    %cst_26 = arith.constant 1.000000e+00 : f32
    %57 = vector.broadcast %cst_26 : f32 to vector<8x128xf32>
    %58 = arith.addf %57, %56 : vector<8x128xf32>
    %59 = arith.divf %57, %58 : vector<8x128xf32>
    %60 = vector.extract_strided_slice %53 {offsets = [0, 128], sizes = [8, 128], strides = [1, 1]} : vector<8x512xf32> to vector<8x128xf32>
    %61 = arith.negf %60 : vector<8x128xf32>
    %62 = math.exp %61 : vector<8x128xf32>
    %cst_27 = arith.constant 1.000000e+00 : f32
    %63 = vector.broadcast %cst_27 : f32 to vector<8x128xf32>
    %64 = arith.addf %63, %62 : vector<8x128xf32>
    %65 = arith.divf %63, %64 : vector<8x128xf32>
    %66 = vector.extract_strided_slice %53 {offsets = [0, 256], sizes = [8, 128], strides = [1, 1]} : vector<8x512xf32> to vector<8x128xf32>
    %67 = math.tanh %66 : vector<8x128xf32>
    %68 = vector.extract_strided_slice %53 {offsets = [0, 384], sizes = [8, 128], strides = [1, 1]} : vector<8x512xf32> to vector<8x128xf32>
    %69 = arith.negf %68 : vector<8x128xf32>
    %70 = math.exp %69 : vector<8x128xf32>
    %cst_28 = arith.constant 1.000000e+00 : f32
    %71 = vector.broadcast %cst_28 : f32 to vector<8x128xf32>
    %72 = arith.addf %71, %70 : vector<8x128xf32>
    %73 = arith.divf %71, %72 : vector<8x128xf32>
    %74 = arith.mulf %65, %43 : vector<8x128xf32>
    %75 = arith.mulf %59, %67 : vector<8x128xf32>
    %76 = arith.addf %74, %75 : vector<8x128xf32>
    %77 = math.tanh %76 : vector<8x128xf32>
    %78 = arith.mulf %73, %77 : vector<8x128xf32>
    %c2_i32 = arith.constant 2 : i32
    %c8_i32_29 = arith.constant 8 : i32
    %79 = arith.muli %c2_i32, %c8_i32_29 : i32
    %80 = tpu.assume_multiple %79, 8 : i32
    %81 = arith.index_cast %80 : i32 to index
    %c0_30 = arith.constant 0 : index
    %82 = vector.load %arg13[%81, %c0_30] : memref<64x512xf32, #tpu.memory_space<vmem>>, vector<8x512xf32>
    %83 = arith.truncf %78 : vector<8x128xf32> to vector<8x128xbf16>
    %c0_31 = arith.constant 0 : index
    %c0_32 = arith.constant 0 : index
    %84 = vector.load %arg7[%c0_31, %c0_32] : memref<128x512xbf16, #tpu.memory_space<vmem>>, vector<128x512xbf16>
    %cst_33 = arith.constant dense<0.000000e+00> : vector<8x512xf32>
    %85 = tpu.matmul %83, %84, %cst_33 {dimension_numbers = #tpu.dot_dimension_numbers<[1], [0], [0], [1], [0, 0, 1, 1], [], []>} : vector<8x128xbf16>, vector<128x512xbf16>, vector<8x512xf32> -> vector<8x512xf32>
    %86 = arith.addf %82, %85 : vector<8x512xf32>
    %87 = vector.extract_strided_slice %86 {offsets = [0, 0], sizes = [8, 128], strides = [1, 1]} : vector<8x512xf32> to vector<8x128xf32>
    %88 = arith.negf %87 : vector<8x128xf32>
    %89 = math.exp %88 : vector<8x128xf32>
    %cst_34 = arith.constant 1.000000e+00 : f32
    %90 = vector.broadcast %cst_34 : f32 to vector<8x128xf32>
    %91 = arith.addf %90, %89 : vector<8x128xf32>
    %92 = arith.divf %90, %91 : vector<8x128xf32>
    %93 = vector.extract_strided_slice %86 {offsets = [0, 128], sizes = [8, 128], strides = [1, 1]} : vector<8x512xf32> to vector<8x128xf32>
    %94 = arith.negf %93 : vector<8x128xf32>
    %95 = math.exp %94 : vector<8x128xf32>
    %cst_35 = arith.constant 1.000000e+00 : f32
    %96 = vector.broadcast %cst_35 : f32 to vector<8x128xf32>
    %97 = arith.addf %96, %95 : vector<8x128xf32>
    %98 = arith.divf %96, %97 : vector<8x128xf32>
    %99 = vector.extract_strided_slice %86 {offsets = [0, 256], sizes = [8, 128], strides = [1, 1]} : vector<8x512xf32> to vector<8x128xf32>
    %100 = math.tanh %99 : vector<8x128xf32>
    %101 = vector.extract_strided_slice %86 {offsets = [0, 384], sizes = [8, 128], strides = [1, 1]} : vector<8x512xf32> to vector<8x128xf32>
    %102 = arith.negf %101 : vector<8x128xf32>
    %103 = math.exp %102 : vector<8x128xf32>
    %cst_36 = arith.constant 1.000000e+00 : f32
    %104 = vector.broadcast %cst_36 : f32 to vector<8x128xf32>
    %105 = arith.addf %104, %103 : vector<8x128xf32>
    %106 = arith.divf %104, %105 : vector<8x128xf32>
    %107 = arith.mulf %98, %76 : vector<8x128xf32>
    %108 = arith.mulf %92, %100 : vector<8x128xf32>
    %109 = arith.addf %107, %108 : vector<8x128xf32>
    %110 = math.tanh %109 : vector<8x128xf32>
    %111 = arith.mulf %106, %110 : vector<8x128xf32>
    %c3_i32 = arith.constant 3 : i32
    %c8_i32_37 = arith.constant 8 : i32
    %112 = arith.muli %c3_i32, %c8_i32_37 : i32
    %113 = tpu.assume_multiple %112, 8 : i32
    %114 = arith.index_cast %113 : i32 to index
    %c0_38 = arith.constant 0 : index
    %115 = vector.load %arg13[%114, %c0_38] : memref<64x512xf32, #tpu.memory_space<vmem>>, vector<8x512xf32>
    %116 = arith.truncf %111 : vector<8x128xf32> to vector<8x128xbf16>
    %c0_39 = arith.constant 0 : index
    %c0_40 = arith.constant 0 : index
    %117 = vector.load %arg7[%c0_39, %c0_40] : memref<128x512xbf16, #tpu.memory_space<vmem>>, vector<128x512xbf16>
    %cst_41 = arith.constant dense<0.000000e+00> : vector<8x512xf32>
    %118 = tpu.matmul %116, %117, %cst_41 {dimension_numbers = #tpu.dot_dimension_numbers<[1], [0], [0], [1], [0, 0, 1, 1], [], []>} : vector<8x128xbf16>, vector<128x512xbf16>, vector<8x512xf32> -> vector<8x512xf32>
    %119 = arith.addf %115, %118 : vector<8x512xf32>
    %120 = vector.extract_strided_slice %119 {offsets = [0, 0], sizes = [8, 128], strides = [1, 1]} : vector<8x512xf32> to vector<8x128xf32>
    %121 = arith.negf %120 : vector<8x128xf32>
    %122 = math.exp %121 : vector<8x128xf32>
    %cst_42 = arith.constant 1.000000e+00 : f32
    %123 = vector.broadcast %cst_42 : f32 to vector<8x128xf32>
    %124 = arith.addf %123, %122 : vector<8x128xf32>
    %125 = arith.divf %123, %124 : vector<8x128xf32>
    %126 = vector.extract_strided_slice %119 {offsets = [0, 128], sizes = [8, 128], strides = [1, 1]} : vector<8x512xf32> to vector<8x128xf32>
    %127 = arith.negf %126 : vector<8x128xf32>
    %128 = math.exp %127 : vector<8x128xf32>
    %cst_43 = arith.constant 1.000000e+00 : f32
    %129 = vector.broadcast %cst_43 : f32 to vector<8x128xf32>
    %130 = arith.addf %129, %128 : vector<8x128xf32>
    %131 = arith.divf %129, %130 : vector<8x128xf32>
    %132 = vector.extract_strided_slice %119 {offsets = [0, 256], sizes = [8, 128], strides = [1, 1]} : vector<8x512xf32> to vector<8x128xf32>
    %133 = math.tanh %132 : vector<8x128xf32>
    %134 = vector.extract_strided_slice %119 {offsets = [0, 384], sizes = [8, 128], strides = [1, 1]} : vector<8x512xf32> to vector<8x128xf32>
    %135 = arith.negf %134 : vector<8x128xf32>
    %136 = math.exp %135 : vector<8x128xf32>
    %cst_44 = arith.constant 1.000000e+00 : f32
    %137 = vector.broadcast %cst_44 : f32 to vector<8x128xf32>
    %138 = arith.addf %137, %136 : vector<8x128xf32>
    %139 = arith.divf %137, %138 : vector<8x128xf32>
    %140 = arith.mulf %131, %109 : vector<8x128xf32>
    %141 = arith.mulf %125, %133 : vector<8x128xf32>
    %142 = arith.addf %140, %141 : vector<8x128xf32>
    %143 = math.tanh %142 : vector<8x128xf32>
    %144 = arith.mulf %139, %143 : vector<8x128xf32>
    %c4_i32 = arith.constant 4 : i32
    %c8_i32_45 = arith.constant 8 : i32
    %145 = arith.muli %c4_i32, %c8_i32_45 : i32
    %146 = tpu.assume_multiple %145, 8 : i32
    %147 = arith.index_cast %146 : i32 to index
    %c0_46 = arith.constant 0 : index
    %148 = vector.load %arg13[%147, %c0_46] : memref<64x512xf32, #tpu.memory_space<vmem>>, vector<8x512xf32>
    %149 = arith.truncf %144 : vector<8x128xf32> to vector<8x128xbf16>
    %c0_47 = arith.constant 0 : index
    %c0_48 = arith.constant 0 : index
    %150 = vector.load %arg7[%c0_47, %c0_48] : memref<128x512xbf16, #tpu.memory_space<vmem>>, vector<128x512xbf16>
    %cst_49 = arith.constant dense<0.000000e+00> : vector<8x512xf32>
    %151 = tpu.matmul %149, %150, %cst_49 {dimension_numbers = #tpu.dot_dimension_numbers<[1], [0], [0], [1], [0, 0, 1, 1], [], []>} : vector<8x128xbf16>, vector<128x512xbf16>, vector<8x512xf32> -> vector<8x512xf32>
    %152 = arith.addf %148, %151 : vector<8x512xf32>
    %153 = vector.extract_strided_slice %152 {offsets = [0, 0], sizes = [8, 128], strides = [1, 1]} : vector<8x512xf32> to vector<8x128xf32>
    %154 = arith.negf %153 : vector<8x128xf32>
    %155 = math.exp %154 : vector<8x128xf32>
    %cst_50 = arith.constant 1.000000e+00 : f32
    %156 = vector.broadcast %cst_50 : f32 to vector<8x128xf32>
    %157 = arith.addf %156, %155 : vector<8x128xf32>
    %158 = arith.divf %156, %157 : vector<8x128xf32>
    %159 = vector.extract_strided_slice %152 {offsets = [0, 128], sizes = [8, 128], strides = [1, 1]} : vector<8x512xf32> to vector<8x128xf32>
    %160 = arith.negf %159 : vector<8x128xf32>
    %161 = math.exp %160 : vector<8x128xf32>
    %cst_51 = arith.constant 1.000000e+00 : f32
    %162 = vector.broadcast %cst_51 : f32 to vector<8x128xf32>
    %163 = arith.addf %162, %161 : vector<8x128xf32>
    %164 = arith.divf %162, %163 : vector<8x128xf32>
    %165 = vector.extract_strided_slice %152 {offsets = [0, 256], sizes = [8, 128], strides = [1, 1]} : vector<8x512xf32> to vector<8x128xf32>
    %166 = math.tanh %165 : vector<8x128xf32>
    %167 = vector.extract_strided_slice %152 {offsets = [0, 384], sizes = [8, 128], strides = [1, 1]} : vector<8x512xf32> to vector<8x128xf32>
    %168 = arith.negf %167 : vector<8x128xf32>
    %169 = math.exp %168 : vector<8x128xf32>
    %cst_52 = arith.constant 1.000000e+00 : f32
    %170 = vector.broadcast %cst_52 : f32 to vector<8x128xf32>
    %171 = arith.addf %170, %169 : vector<8x128xf32>
    %172 = arith.divf %170, %171 : vector<8x128xf32>
    %173 = arith.mulf %164, %142 : vector<8x128xf32>
    %174 = arith.mulf %158, %166 : vector<8x128xf32>
    %175 = arith.addf %173, %174 : vector<8x128xf32>
    %176 = math.tanh %175 : vector<8x128xf32>
    %177 = arith.mulf %172, %176 : vector<8x128xf32>
    %c5_i32 = arith.constant 5 : i32
    %c8_i32_53 = arith.constant 8 : i32
    %178 = arith.muli %c5_i32, %c8_i32_53 : i32
    %179 = tpu.assume_multiple %178, 8 : i32
    %180 = arith.index_cast %179 : i32 to index
    %c0_54 = arith.constant 0 : index
    %181 = vector.load %arg13[%180, %c0_54] : memref<64x512xf32, #tpu.memory_space<vmem>>, vector<8x512xf32>
    %182 = arith.truncf %177 : vector<8x128xf32> to vector<8x128xbf16>
    %c0_55 = arith.constant 0 : index
    %c0_56 = arith.constant 0 : index
    %183 = vector.load %arg7[%c0_55, %c0_56] : memref<128x512xbf16, #tpu.memory_space<vmem>>, vector<128x512xbf16>
    %cst_57 = arith.constant dense<0.000000e+00> : vector<8x512xf32>
    %184 = tpu.matmul %182, %183, %cst_57 {dimension_numbers = #tpu.dot_dimension_numbers<[1], [0], [0], [1], [0, 0, 1, 1], [], []>} : vector<8x128xbf16>, vector<128x512xbf16>, vector<8x512xf32> -> vector<8x512xf32>
    %185 = arith.addf %181, %184 : vector<8x512xf32>
    %186 = vector.extract_strided_slice %185 {offsets = [0, 0], sizes = [8, 128], strides = [1, 1]} : vector<8x512xf32> to vector<8x128xf32>
    %187 = arith.negf %186 : vector<8x128xf32>
    %188 = math.exp %187 : vector<8x128xf32>
    %cst_58 = arith.constant 1.000000e+00 : f32
    %189 = vector.broadcast %cst_58 : f32 to vector<8x128xf32>
    %190 = arith.addf %189, %188 : vector<8x128xf32>
    %191 = arith.divf %189, %190 : vector<8x128xf32>
    %192 = vector.extract_strided_slice %185 {offsets = [0, 128], sizes = [8, 128], strides = [1, 1]} : vector<8x512xf32> to vector<8x128xf32>
    %193 = arith.negf %192 : vector<8x128xf32>
    %194 = math.exp %193 : vector<8x128xf32>
    %cst_59 = arith.constant 1.000000e+00 : f32
    %195 = vector.broadcast %cst_59 : f32 to vector<8x128xf32>
    %196 = arith.addf %195, %194 : vector<8x128xf32>
    %197 = arith.divf %195, %196 : vector<8x128xf32>
    %198 = vector.extract_strided_slice %185 {offsets = [0, 256], sizes = [8, 128], strides = [1, 1]} : vector<8x512xf32> to vector<8x128xf32>
    %199 = math.tanh %198 : vector<8x128xf32>
    %200 = vector.extract_strided_slice %185 {offsets = [0, 384], sizes = [8, 128], strides = [1, 1]} : vector<8x512xf32> to vector<8x128xf32>
    %201 = arith.negf %200 : vector<8x128xf32>
    %202 = math.exp %201 : vector<8x128xf32>
    %cst_60 = arith.constant 1.000000e+00 : f32
    %203 = vector.broadcast %cst_60 : f32 to vector<8x128xf32>
    %204 = arith.addf %203, %202 : vector<8x128xf32>
    %205 = arith.divf %203, %204 : vector<8x128xf32>
    %206 = arith.mulf %197, %175 : vector<8x128xf32>
    %207 = arith.mulf %191, %199 : vector<8x128xf32>
    %208 = arith.addf %206, %207 : vector<8x128xf32>
    %209 = math.tanh %208 : vector<8x128xf32>
    %210 = arith.mulf %205, %209 : vector<8x128xf32>
    %c6_i32 = arith.constant 6 : i32
    %c8_i32_61 = arith.constant 8 : i32
    %211 = arith.muli %c6_i32, %c8_i32_61 : i32
    %212 = tpu.assume_multiple %211, 8 : i32
    %213 = arith.index_cast %212 : i32 to index
    %c0_62 = arith.constant 0 : index
    %214 = vector.load %arg13[%213, %c0_62] : memref<64x512xf32, #tpu.memory_space<vmem>>, vector<8x512xf32>
    %215 = arith.truncf %210 : vector<8x128xf32> to vector<8x128xbf16>
    %c0_63 = arith.constant 0 : index
    %c0_64 = arith.constant 0 : index
    %216 = vector.load %arg7[%c0_63, %c0_64] : memref<128x512xbf16, #tpu.memory_space<vmem>>, vector<128x512xbf16>
    %cst_65 = arith.constant dense<0.000000e+00> : vector<8x512xf32>
    %217 = tpu.matmul %215, %216, %cst_65 {dimension_numbers = #tpu.dot_dimension_numbers<[1], [0], [0], [1], [0, 0, 1, 1], [], []>} : vector<8x128xbf16>, vector<128x512xbf16>, vector<8x512xf32> -> vector<8x512xf32>
    %218 = arith.addf %214, %217 : vector<8x512xf32>
    %219 = vector.extract_strided_slice %218 {offsets = [0, 0], sizes = [8, 128], strides = [1, 1]} : vector<8x512xf32> to vector<8x128xf32>
    %220 = arith.negf %219 : vector<8x128xf32>
    %221 = math.exp %220 : vector<8x128xf32>
    %cst_66 = arith.constant 1.000000e+00 : f32
    %222 = vector.broadcast %cst_66 : f32 to vector<8x128xf32>
    %223 = arith.addf %222, %221 : vector<8x128xf32>
    %224 = arith.divf %222, %223 : vector<8x128xf32>
    %225 = vector.extract_strided_slice %218 {offsets = [0, 128], sizes = [8, 128], strides = [1, 1]} : vector<8x512xf32> to vector<8x128xf32>
    %226 = arith.negf %225 : vector<8x128xf32>
    %227 = math.exp %226 : vector<8x128xf32>
    %cst_67 = arith.constant 1.000000e+00 : f32
    %228 = vector.broadcast %cst_67 : f32 to vector<8x128xf32>
    %229 = arith.addf %228, %227 : vector<8x128xf32>
    %230 = arith.divf %228, %229 : vector<8x128xf32>
    %231 = vector.extract_strided_slice %218 {offsets = [0, 256], sizes = [8, 128], strides = [1, 1]} : vector<8x512xf32> to vector<8x128xf32>
    %232 = math.tanh %231 : vector<8x128xf32>
    %233 = vector.extract_strided_slice %218 {offsets = [0, 384], sizes = [8, 128], strides = [1, 1]} : vector<8x512xf32> to vector<8x128xf32>
    %234 = arith.negf %233 : vector<8x128xf32>
    %235 = math.exp %234 : vector<8x128xf32>
    %cst_68 = arith.constant 1.000000e+00 : f32
    %236 = vector.broadcast %cst_68 : f32 to vector<8x128xf32>
    %237 = arith.addf %236, %235 : vector<8x128xf32>
    %238 = arith.divf %236, %237 : vector<8x128xf32>
    %239 = arith.mulf %230, %208 : vector<8x128xf32>
    %240 = arith.mulf %224, %232 : vector<8x128xf32>
    %241 = arith.addf %239, %240 : vector<8x128xf32>
    %242 = math.tanh %241 : vector<8x128xf32>
    %243 = arith.mulf %238, %242 : vector<8x128xf32>
    %c7_i32 = arith.constant 7 : i32
    %c8_i32_69 = arith.constant 8 : i32
    %244 = arith.muli %c7_i32, %c8_i32_69 : i32
    %245 = tpu.assume_multiple %244, 8 : i32
    %246 = arith.index_cast %245 : i32 to index
    %c0_70 = arith.constant 0 : index
    %247 = vector.load %arg13[%246, %c0_70] : memref<64x512xf32, #tpu.memory_space<vmem>>, vector<8x512xf32>
    %248 = arith.truncf %243 : vector<8x128xf32> to vector<8x128xbf16>
    %c0_71 = arith.constant 0 : index
    %c0_72 = arith.constant 0 : index
    %249 = vector.load %arg7[%c0_71, %c0_72] : memref<128x512xbf16, #tpu.memory_space<vmem>>, vector<128x512xbf16>
    %cst_73 = arith.constant dense<0.000000e+00> : vector<8x512xf32>
    %250 = tpu.matmul %248, %249, %cst_73 {dimension_numbers = #tpu.dot_dimension_numbers<[1], [0], [0], [1], [0, 0, 1, 1], [], []>} : vector<8x128xbf16>, vector<128x512xbf16>, vector<8x512xf32> -> vector<8x512xf32>
    %251 = arith.addf %247, %250 : vector<8x512xf32>
    %252 = vector.extract_strided_slice %251 {offsets = [0, 0], sizes = [8, 128], strides = [1, 1]} : vector<8x512xf32> to vector<8x128xf32>
    %253 = arith.negf %252 : vector<8x128xf32>
    %254 = math.exp %253 : vector<8x128xf32>
    %cst_74 = arith.constant 1.000000e+00 : f32
    %255 = vector.broadcast %cst_74 : f32 to vector<8x128xf32>
    %256 = arith.addf %255, %254 : vector<8x128xf32>
    %257 = arith.divf %255, %256 : vector<8x128xf32>
    %258 = vector.extract_strided_slice %251 {offsets = [0, 128], sizes = [8, 128], strides = [1, 1]} : vector<8x512xf32> to vector<8x128xf32>
    %259 = arith.negf %258 : vector<8x128xf32>
    %260 = math.exp %259 : vector<8x128xf32>
    %cst_75 = arith.constant 1.000000e+00 : f32
    %261 = vector.broadcast %cst_75 : f32 to vector<8x128xf32>
    %262 = arith.addf %261, %260 : vector<8x128xf32>
    %263 = arith.divf %261, %262 : vector<8x128xf32>
    %264 = vector.extract_strided_slice %251 {offsets = [0, 256], sizes = [8, 128], strides = [1, 1]} : vector<8x512xf32> to vector<8x128xf32>
    %265 = math.tanh %264 : vector<8x128xf32>
    %266 = vector.extract_strided_slice %251 {offsets = [0, 384], sizes = [8, 128], strides = [1, 1]} : vector<8x512xf32> to vector<8x128xf32>
    %267 = arith.negf %266 : vector<8x128xf32>
    %268 = math.exp %267 : vector<8x128xf32>
    %cst_76 = arith.constant 1.000000e+00 : f32
    %269 = vector.broadcast %cst_76 : f32 to vector<8x128xf32>
    %270 = arith.addf %269, %268 : vector<8x128xf32>
    %271 = arith.divf %269, %270 : vector<8x128xf32>
    %272 = arith.mulf %263, %241 : vector<8x128xf32>
    %273 = arith.mulf %257, %265 : vector<8x128xf32>
    %274 = arith.addf %272, %273 : vector<8x128xf32>
    %275 = math.tanh %274 : vector<8x128xf32>
    %276 = arith.mulf %271, %275 : vector<8x128xf32>
    %c8_i32_77 = arith.constant 8 : i32
    %c0_78 = arith.constant 0 : index
    %c0_79 = arith.constant 0 : index
    %277 = vector.load %arg11[%c0_78, %c0_79] : memref<8x128xf32, #tpu.memory_space<vmem>>, vector<8x128xf32>
    tpu.vector_store %arg11[%c0_78, %c0_79], %276 {strides = array<i32>} : memref<8x128xf32, #tpu.memory_space<vmem>>, vector<8x128xf32>,
    %c0_80 = arith.constant 0 : index
    %c0_81 = arith.constant 0 : index
    %278 = vector.load %arg12[%c0_80, %c0_81] : memref<8x128xf32, #tpu.memory_space<vmem>>, vector<8x128xf32>
    tpu.vector_store %arg12[%c0_80, %c0_81], %274 {strides = array<i32>} : memref<8x128xf32, #tpu.memory_space<vmem>>, vector<8x128xf32>,
    %c0_i32_82 = arith.constant 0 : i32
    %279 = arith.cmpi eq, %arg1, %c0_i32_82 : i32
    %280 = arith.extui %279 : i1 to i32
    %c0_i32_83 = arith.constant 0 : i32
    %281 = arith.cmpi ne, %280, %c0_i32_83 : i32
    scf.if %281 {
      %c0_84 = arith.constant 0 : index
      %c0_85 = arith.constant 0 : index
      %282 = vector.load %arg10[%c0_84, %c0_85] : memref<8x128xf32, #tpu.memory_space<vmem>>, vector<8x128xf32>
      tpu.vector_store %arg10[%c0_84, %c0_85], %276 {strides = array<i32>} : memref<8x128xf32, #tpu.memory_space<vmem>>, vector<8x128xf32>,
    } else {
    }
    return
  }
  func.func @transform_0(%arg0: i32, %arg1: i32) -> (i32, i32) {
    %c0_i32 = arith.constant 0 : i32
    %c0_i32_0 = arith.constant 0 : i32
    return %arg0, %c0_i32 : i32, i32
  }
  func.func @transform_1(%arg0: i32, %arg1: i32) -> (i32, i32, i32) {
    %c0_i32 = arith.constant 0 : i32
    %c0_i32_0 = arith.constant 0 : i32
    return %arg1, %arg0, %c0_i32 : i32, i32, i32
  }
  func.func @transform_2(%arg0: i32, %arg1: i32) -> (i32, i32) {
    %c0_i32 = arith.constant 0 : i32
    %c0_i32_0 = arith.constant 0 : i32
    %c0_i32_1 = arith.constant 0 : i32
    return %c0_i32, %c0_i32_0 : i32, i32
  }
  func.func @transform_3(%arg0: i32, %arg1: i32) -> (i32, i32) {
    %c0_i32 = arith.constant 0 : i32
    %c0_i32_0 = arith.constant 0 : i32
    %c0_i32_1 = arith.constant 0 : i32
    return %c0_i32, %c0_i32_0 : i32, i32
  }
  func.func @transform_4(%arg0: i32, %arg1: i32) -> (i32, i32) {
    %c0_i32 = arith.constant 0 : i32
    %c0_i32_0 = arith.constant 0 : i32
    %c0_i32_1 = arith.constant 0 : i32
    return %c0_i32, %c0_i32_0 : i32, i32
  }
  func.func @transform_5(%arg0: i32, %arg1: i32) -> (i32, i32) {
    %c0_i32 = arith.constant 0 : i32
    %c0_i32_0 = arith.constant 0 : i32
    %c0_i32_1 = arith.constant 0 : i32
    return %c0_i32, %c0_i32_0 : i32, i32
  }
  func.func @transform_6(%arg0: i32, %arg1: i32) -> (i32, i32) {
    %c0_i32 = arith.constant 0 : i32
    %c0_i32_0 = arith.constant 0 : i32
    %c0_i32_1 = arith.constant 0 : i32
    return %c0_i32, %c0_i32_0 : i32, i32
  }
  func.func @transform_7(%arg0: i32, %arg1: i32) -> (i32, i32) {
    %c0_i32 = arith.constant 0 : i32
    %c0_i32_0 = arith.constant 0 : i32
    return %arg0, %c0_i32 : i32, i32
  }
  func.func @transform_8(%arg0: i32, %arg1: i32) -> (i32, i32) {
    %c0_i32 = arith.constant 0 : i32
    %c0_i32_0 = arith.constant 0 : i32
    return %arg0, %c0_i32 : i32, i32
  }
}

</mosaic_0001>

<bundles_post_ra>
// kernel: tpu_custom_call.1
= control target key start
LH: loop header
LB: loop body
LE: loop exit
PB: predicated region body
PF: predicated region fallthrough
CT: control target
= control target key end

     0   :  { %14 = vsyncpa [#allocation6], 0  ;;  %s2586_s0 = inlined_call_operand.vmem [shape: bf16[8,4], index: 0, kind: input, shape index: {}]   ;;  %s2587_s1 = inlined_call_operand.vmem [shape: bf16[8,8,6], index: 1, kind: input, shape index: {}]   ;;  %s2588_s2 = inlined_call_operand.vmem [shape: bf16[4,128], index: 2, kind: input, shape index: {}]   ;;  %s2589_s3 = inlined_call_operand.vmem [shape: f32[1,128], index: 3, kind: input, shape index: {}]   ;;  %s2590_s4 = inlined_call_operand.vmem [shape: bf16[6,512], index: 4, kind: input, shape index: {}]   ;;  %s2591_s5 = inlined_call_operand.hbm [shape: bf16[128,512], index: 5, kind: input, shape index: {}]   ;;  %s2592_s6 = inlined_call_operand.vmem [shape: f32[1,512], index: 6, kind: input, shape index: {}]   ;;  %s2593_s7 = inlined_call_operand.hbm [shape: f32[8,128], index: 7, kind: output, shape index: {0}]   ;;  %s2594_s8 = inlined_call_operand.hbm [shape: f32[8,128], index: 8, kind: output, shape index: {1}]  }
   0x1   :  { %15 = vsyncpa [#allocation7], 0 }
   0x2   :  { %16 = vsyncpa [#allocation10], 0  ;;  %s1936_s27 = smov [#allocation5]   ;;  %s1864_s9 = scalar_lea.hbm %s2591_s5, 4096 }
   0x3   :  { %s32_s28 = sshll.u32 %s1936_s27, 4  ;;  %p1865_p0 = scmp.ne.s32.totalorder %s2591_s5, %s1864_s9  ;;  %s33_s28 = int_to_ptr.vmem [resolvable:$true] %s32_s28 }
   0x4   :  { %p1868_p1 = scmp.lt.u32.totalorder %s1864_s9, %s2591_s5 }
   0x6   :  { %p1870_p2 = pnand %p1868_p1, %p1865_p0 }
   0x8   :  { %1873 = shalt.err (!%p1870_p2)
}
   0x9   :  { %s1874_s14 = scalar_lea.vmem %s33_s28, 4096  ;;  %p1879_p4 = scmp.lt.s32.totalorder %s33_s28, %s33_s28 }
   0xa   :  { %p1875_p3 = scmp.ne.s32.totalorder %s33_s28, %s1874_s14  ;;  %p1880_p5 = scmp.lt.s32.totalorder %s1874_s14, %s1874_s14 }
   0xc   :  { %p1881_p6 = por %p1880_p5, %p1879_p4 }
   0xe   :  { %p1882_p7 = pnand %p1881_p6, %p1875_p3 }
  0x10   :  { %1885 = shalt.err (!%p1882_p7)
}
  0x11   :  { %s1937_s15 = smov 256   ;;  %s1938_s16 = smov 16  }
  0x12   :  { %38 = dma.hbm_to_vmem [thread:$0]  %s2591_s5, 4096, %s33_s28, [#allocation6], %s1937_s15, %s1937_s15, %s1938_s16  }
  0x13   :  { %1930 = dma.done.wait [#allocation6], 4096  }
  0x14   :  { %1931 = vsyncadd [#allocation6], 4294963200  ;;  %v1939_v0 = vmov 0.0   ;;  %vm1940_vm0 = vmmov 0   ;;  %v2595_v1 = vmov 0   ;;  %vm64_vm1 = vcmask 1041408  }
  0x15   :  { %1633 = vmatprep.subr.bf16.mxu0 %v1939_v0  ;;  %1635 = vmatprep.mubr.msk.bf16.mxu0 %vm1940_vm0, %v1939_v0  ;;  %vm184_vm2 = vcmask 1042432   ;;  %v52_v2 = vld [vmem:[%s2588_s2] sm:$0x3]  ;;  %vm60_vm3 = vcmask 31744   ;;  %v2012_v8 = vld [vmem:[#allocation5 + $0x4] ss:$16 sps:$4 sm:$0xff]   ;;  %v121_v50 = vlaneseq }
  0x16   :  { %229 = vmatprep.mubr.bf16.mxu1 %v2595_v1  ;;  %v117_v3 = vld [vmem:[%s2590_s4] sm:$0x77]  ;;  %v66_v5 = vsel %vm64_vm1, %v52_v2, 0  ;;  %v118_v11 = vld [vmem:[%s2590_s4 + $0x8] sm:$0x77]  ;;  %vm171_vm4 = vcmask 48128  }
  0x17   :  { %v51_v4 = vld [vmem:[%s2586_s0] sm:$0xf]  ;;  %v1562_v6 = vcombine.high %v117_v3, %v117_v3  ;;  %v1561_v7 = vcombine.low %v117_v3, %v117_v3  ;;  %1634 = vmatpush3.bf16.msra.mxu0 %v66_v5  ;;  %v2022_v12 = vld [vmem:[#allocation5] ss:$16 sps:$4 sm:$0xff]   ;;  %v1564_v13 = vcombine.high %v118_v11, %v118_v11  ;;  %v1563_v14 = vcombine.low %v118_v11, %v118_v11  ;;  %v2024_v15 = vld [vmem:[#allocation5 + $0x24] ss:$16 sps:$4 sm:$0xff]  }
  0x18   :  { %v1650_v10 = vld [vmem:[%s2587_s1] sm:$0xff]   ;;  %v2034_v18 = vld [vmem:[#allocation5 + $0x20] ss:$16 sps:$4 sm:$0xff]   ;;  %v2041_v20 = vld [vmem:[#allocation5 + $0x44] ss:$16 sps:$4 sm:$0xff]   ;;  %v1942_v49 = vmov 0.0|0.0  }
  0x19   :  { %1565 = vmatprep.subr.msk.bf16.mxu1 %vm184_vm2, %v1562_v6  ;;  %v186_v9 = vsel %vm184_vm2, %v1561_v7, 0  ;;  %v2027_v16 = vld [vmem:[#allocation5 + $0xc] ss:$16 sps:$4 sm:$0xff]   ;;  %1570 = vmatprep.subr.msk.bf16.mxu0 %vm184_vm2, %v1564_v13  ;;  %v192_v17 = vsel %vm184_vm2, %v1563_v14, 0  ;;  %v2039_v19 = vld [vmem:[#allocation5 + $0x8] ss:$16 sps:$4 sm:$0xff]  }
  0x1a   :  { %198 = vmatpush1.bf16.msra.mxu1 %v186_v9  ;;  %1636 = vmatmul.mubr.msk.bf16.vlgmr.msra.gmra.mrb[0].mxu0 %vm60_vm3, %v51_v4  ;;  %v1662_v21 = vld [vmem:[%s2587_s1 + $0x8] sm:$0xff]   ;;  %v2046_v22 = vld [vmem:[#allocation5 + $0x2c] ss:$16 sps:$4 sm:$0xff]   ;;  %v2056_v25 = vld [vmem:[#allocation5 + $0x28] ss:$16 sps:$4 sm:$0xff]   ;;  %v122_v51 = vshrl.u32 %v121_v50, 7 }
  0x1b   :  { %577 = vmatprep.subr.bf16.mxu1 %v2012_v8  ;;  %302 = vmatprep.mubr.bf16.mxu0 %v2595_v1  ;;  %v2049_v23 = vld [vmem:[#allocation5 + $0x40] ss:$16 sps:$4 sm:$0xff]   ;;  %v2053_v24 = vld [vmem:[#allocation5 + $0x64] ss:$16 sps:$4 sm:$0xff]   ;;  %v2061_v26 = vld [vmem:[#allocation5 + $0x4c] ss:$16 sps:$4 sm:$0xff]  }
  0x1c   :  { %271 = vmatpush1.bf16.msra.mxu0 %v192_v17  ;;  %v2064_v27 = vld [vmem:[#allocation5 + $0x60] ss:$16 sps:$4 sm:$0xff]   ;;  %v2068_v28 = vld [vmem:[#allocation5 + $0x84] ss:$16 sps:$4 sm:$0xff]   ;;  %v2071_v29 = vld [vmem:[#allocation5 + $0x48] ss:$16 sps:$4 sm:$0xff]  }
  0x1d   :  { %1566 = vmatmul.mubr.msk.bf16.vlgmr.msra.gmra.mrb[0].mxu1 %vm171_vm4, %v1650_v10  ;;  %618 = vmatprep.subr.bf16.mxu0 %v2027_v16  ;;  %v1675_v30 = vld [vmem:[%s2587_s1 + $0x10] sm:$0xff]   ;;  %v2080_v32 = vld [vmem:[#allocation5 + $0x80] ss:$16 sps:$4 sm:$0xff]   ;;  %v2084_v33 = vld [vmem:[#allocation5 + $0xa4] ss:$16 sps:$4 sm:$0xff]   ;;  %v123_v53 = vsub.s32 0, %v122_v51 }
  0x1e   :  { %578 = vmatpush1.bf16.msra.mxu1 %v2022_v12  ;;  %239 = vmatprep.mubr.bf16.mxu1 %v2595_v1  ;;  %v2077_v31 = vld [vmem:[#allocation5 + $0x6c] ss:$16 sps:$4 sm:$0xff]   ;;  %v2087_v34 = vld [vmem:[#allocation5 + $0x68] ss:$16 sps:$4 sm:$0xff]   ;;  %v2095_v36 = vld [vmem:[#allocation5 + $0xa0] ss:$16 sps:$4 sm:$0xff]  }
  0x1f   :  { %579 = vmatprep.subr.bf16.mxu1 %v2024_v15  ;;  %v2092_v35 = vld [vmem:[#allocation5 + $0x8c] ss:$16 sps:$4 sm:$0xff]   ;;  %v2099_v37 = vld [vmem:[#allocation5 + $0xc4] ss:$16 sps:$4 sm:$0xff]   ;;  %v2102_v38 = vld [vmem:[#allocation5 + $0x88] ss:$16 sps:$4 sm:$0xff]  }
  0x20   :  { %v1688_v39 = vld [vmem:[%s2587_s1 + $0x18] sm:$0xff]   ;;  %v2108_v40 = vld [vmem:[#allocation5 + $0xac] ss:$16 sps:$4 sm:$0xff]   ;;  %v2118_v43 = vld [vmem:[#allocation5 + $0xa8] ss:$16 sps:$4 sm:$0xff]   ;;  %v127_v55 = vsub.s32 1, %v122_v51 }
  0x21   :  { %v2111_v41 = vld [vmem:[#allocation5 + $0xc0] ss:$16 sps:$4 sm:$0xff]   ;;  %v2115_v42 = vld [vmem:[#allocation5 + $0xe4] ss:$16 sps:$4 sm:$0xff]   ;;  %v2123_v44 = vld [vmem:[#allocation5 + $0xcc] ss:$16 sps:$4 sm:$0xff]  }
  0x22   :  { %580 = vmatpush1.bf16.msra.mxu1 %v2034_v18  ;;  %1571 = vmatmul.mubr.msk.bf16.vlgmr.msra.gmra.mrb[4].mxu0 %vm171_vm4, %v1650_v10  ;;  %v2126_v45 = vld [vmem:[#allocation5 + $0xe0] ss:$16 sps:$4 sm:$0xff]   ;;  %v2131_v46 = vld [vmem:[#allocation5 + $0xc8] ss:$16 sps:$4 sm:$0xff]   ;;  %v2134_v47 = vld [vmem:[#allocation5 + $0xec] ss:$16 sps:$4 sm:$0xff]  }
  0x23   :  { %581 = vmatprep.subr.bf16.mxu1 %v2041_v20  ;;  %619 = vmatpush1.bf16.msra.mxu0 %v2039_v19  ;;  %v2140_v48 = vld [vmem:[#allocation5 + $0xe8] ss:$16 sps:$4 sm:$0xff]   ;;  %v131_v0 = vsub.s32 2, %v122_v51  ;;  %v135_v4 = vsub.s32 3, %v122_v51 }
  0x24   :  { %312 = vmatprep.mubr.bf16.mxu0 %v2595_v1  ;;  %620 = vmatprep.subr.bf16.mxu0 %v2046_v22  ;;  %v1555_v52 = vld [vmem:[%s2589_s3] ss:$0 sm:$0xff]  ;;  %s1943_s3 = smov [#allocation8]  }
  0x25   :  { %1567 = vmatmul.mubr.msk.bf16.gmra.mrb[4].mxu1 %vm171_vm4, %v1662_v21  ;;  %v119_v54 = vld [vmem:[%s2592_s6] sm:$0xf]  ;;  %s1525_s6 = sshll.u32 %s1943_s3, 4  ;;  %s1526_s6 = int_to_ptr.vmem [resolvable:$true] %s1525_s6 }
  0x26   :  { %582 = vmatpush1.bf16.msra.mxu1 %v2049_v23  ;;  %249 = vmatprep.mubr.bf16.mxu1 %v2595_v1  ;;  %v124_v61 = vrot.slane %v119_v54, %v123_v53  ;;  %v128_v2 = vrot.slane %v119_v54, %v127_v55  ;;  %v2190_v9 = vrot.slane %v119_v54, %v131_v0  ;;  %s1886_s12 = scalar_lea.vmem %s1526_s6, 128  ;;  %p1891_p9 = scmp.lt.s32.totalorder %s1526_s6, %s1526_s6 }
  0x27   :  { %583 = vmatprep.subr.bf16.mxu1 %v2053_v24  ;;  %621 = vmatpush1.bf16.msra.mxu0 %v2056_v25  ;;  %v2194_v11 = vrot.slane %v119_v54, %v135_v4  ;;  %p1887_p8 = scmp.ne.s32.totalorder %s1526_s6, %s1886_s12  ;;  %p1892_p10 = scmp.lt.s32.totalorder %s1886_s12, %s1886_s12 }
  0x28   :  { %622 = vmatprep.subr.bf16.mxu0 %v2061_v26 }
  0x29   :  { %p1893_p11 = por %p1892_p10, %p1891_p9 }
  0x2a   :  { %584 = vmatpush1.bf16.msra.mxu1 %v2064_v27  ;;  %1572 = vmatmul.mubr.msk.bf16.gmra.mrb[8].mxu0 %vm171_vm4, %v1662_v21 }
  0x2b   :  { %585 = vmatprep.subr.bf16.mxu1 %v2068_v28  ;;  %623 = vmatpush1.bf16.msra.mxu0 %v2071_v29  ;;  %p1894_p12 = pnand %p1893_p11, %p1887_p8 }
  0x2c   :  { %322 = vmatprep.mubr.bf16.mxu0 %v2595_v1  ;;  %624 = vmatprep.subr.bf16.mxu0 %v2077_v31 }
  0x2d   :  { %1568 = vmatmul.mubr.msk.bf16.gmra.mrb[8].mxu1 %vm171_vm4, %v1675_v30 }
  0x2e   :  { %586 = vmatpush1.bf16.msra.mxu1 %v2080_v32  ;;  %259 = vmatprep.mubr.bf16.mxu1 %v2595_v1 }
  0x2f   :  { %587 = vmatprep.subr.bf16.mxu1 %v2084_v33  ;;  %625 = vmatpush1.bf16.msra.mxu0 %v2087_v34 }
  0x30   :  { %626 = vmatprep.subr.bf16.mxu0 %v2092_v35 }
  0x32   :  { %588 = vmatpush1.bf16.msra.mxu1 %v2095_v36  ;;  %1573 = vmatmul.mubr.msk.bf16.gmra.mrb[12].mxu0 %vm171_vm4, %v1675_v30 }
  0x33   :  { %589 = vmatprep.subr.bf16.mxu1 %v2099_v37  ;;  %627 = vmatpush1.bf16.msra.mxu0 %v2102_v38 }
  0x34   :  { %332 = vmatprep.mubr.bf16.mxu0 %v2595_v1  ;;  %628 = vmatprep.subr.bf16.mxu0 %v2108_v40 }
  0x35   :  { %1569 = vmatmul.mubr.msk.bf16.gmra.mrb[12].mxu1 %vm171_vm4, %v1688_v39 }
  0x36   :  { %590 = vmatpush1.bf16.msra.mxu1 %v2111_v41  ;;  %609 = vmatprep.mubr.bf16.mxu1 %v2595_v1 }
  0x37   :  { %591 = vmatprep.subr.bf16.mxu1 %v2115_v42  ;;  %629 = vmatpush1.bf16.msra.mxu0 %v2118_v43 }
  0x38   :  { %630 = vmatprep.subr.bf16.mxu0 %v2123_v44 }
  0x3a   :  { %592 = vmatpush1.bf16.msra.mxu1 %v2126_v45  ;;  %1574 = vmatmul.mubr.msk.bf16.gmra.mrb[16].mxu0 %vm171_vm4, %v1688_v39 }
  0x3b   :  { %695 = vmatprep.subr.bf16.mxu1 %v2012_v8  ;;  %631 = vmatpush1.bf16.msra.mxu0 %v2131_v46 }
  0x3c   :  { %650 = vmatprep.mubr.bf16.mxu0 %v2595_v1  ;;  %632 = vmatprep.subr.bf16.mxu0 %v2134_v47 }
  0x3d   :  { %610 = vmatmul.mubr.bf16.vlgmr.msra.gmra.mrb[16].mxu1 %v1942_v49 }
  0x3e   :  { %696 = vmatpush1.bf16.msra.mxu1 %v2022_v12  ;;  %727 = vmatprep.mubr.bf16.mxu1 %v2595_v1 }
  0x3f   :  { %697 = vmatprep.subr.bf16.mxu1 %v2024_v15  ;;  %633 = vmatpush1.bf16.msra.mxu0 %v2140_v48 }
  0x40   :  { %736 = vmatprep.subr.bf16.mxu0 %v2027_v16 }
  0x42   :  { %698 = vmatpush1.bf16.msra.mxu1 %v2034_v18  ;;  %651 = vmatmul.mubr.bf16.vlgmr.msra.gmra.mrb[20].mxu0 %v1942_v49 }
  0x43   :  { %699 = vmatprep.subr.bf16.mxu1 %v2041_v20  ;;  %737 = vmatpush1.bf16.msra.mxu0 %v2039_v19 }
  0x44   :  { %768 = vmatprep.mubr.bf16.mxu0 %v2595_v1  ;;  %738 = vmatprep.subr.bf16.mxu0 %v2046_v22 }
  0x46   :  { %700 = vmatpush1.bf16.msra.mxu1 %v2049_v23 }
  0x47   :  { %701 = vmatprep.subr.bf16.mxu1 %v2053_v24  ;;  %739 = vmatpush1.bf16.msra.mxu0 %v2056_v25 }
  0x48   :  { %740 = vmatprep.subr.bf16.mxu0 %v2061_v26 }
  0x4a   :  { %702 = vmatpush1.bf16.msra.mxu1 %v2064_v27 }
  0x4b   :  { %703 = vmatprep.subr.bf16.mxu1 %v2068_v28  ;;  %741 = vmatpush1.bf16.msra.mxu0 %v2071_v29 }
  0x4c   :  { %742 = vmatprep.subr.bf16.mxu0 %v2077_v31 }
  0x4e   :  { %704 = vmatpush1.bf16.msra.mxu1 %v2080_v32 }
  0x4f   :  { %705 = vmatprep.subr.bf16.mxu1 %v2084_v33  ;;  %743 = vmatpush1.bf16.msra.mxu0 %v2087_v34 }
  0x50   :  { %744 = vmatprep.subr.bf16.mxu0 %v2092_v35 }
  0x52   :  { %706 = vmatpush1.bf16.msra.mxu1 %v2095_v36 }
  0x53   :  { %707 = vmatprep.subr.bf16.mxu1 %v2099_v37  ;;  %745 = vmatpush1.bf16.msra.mxu0 %v2102_v38 }
  0x54   :  { %746 = vmatprep.subr.bf16.mxu0 %v2108_v40 }
  0x56   :  { %708 = vmatpush1.bf16.msra.mxu1 %v2111_v41 }
  0x57   :  { %709 = vmatprep.subr.bf16.mxu1 %v2115_v42  ;;  %747 = vmatpush1.bf16.msra.mxu0 %v2118_v43 }
  0x58   :  { %748 = vmatprep.subr.bf16.mxu0 %v2123_v44 }
  0x5a   :  { %710 = vmatpush1.bf16.msra.mxu1 %v2126_v45 }
  0x5b   :  { %813 = vmatprep.subr.bf16.mxu1 %v2012_v8  ;;  %749 = vmatpush1.bf16.msra.mxu0 %v2131_v46 }
  0x5c   :  { %750 = vmatprep.subr.bf16.mxu0 %v2134_v47 }
  0x5f   :  { %751 = vmatpush1.bf16.msra.mxu0 %v2140_v48 }
  0x60   :  { %854 = vmatprep.subr.bf16.mxu0 %v2027_v16 }
  0xed   :  { %v102_v56 = vpop.f32.mrb[0].mxu0 }
  0xee   :  { %v103_v57 = vadd.f32 %v1555_v52, %v102_v56  ;;  %v1637_v58 = vpop.f32.mrb[1].mxu0 }
  0xef   :  { %v105_v60 = vpop.f32.mrb[2].mxu0 }
  0xf0   :  { %v231_v59 = vpop.f32.mrb[0].mxu1  ;;  %108 = vst [vmem:[#allocation8] sm:$0xff] %v103_v57  ;;  %v1638_v63 = vpop.f32.mrb[3].mxu0 }
  0xf1   :  { %v233_v62 = vpop.f32.mrb[1].mxu1 }
  0xf2   :  { %v235_v3 = vpop.f32.mrb[2].mxu1 }
  0xf3   :  { %v2186_v5 = vadd.f32 %v235_v3, %v124_v61  ;;  %v237_v6 = vpop.f32.mrb[3].mxu1 }
  0xf4   :  { %v2188_v7 = vadd.f32 %v237_v6, %v128_v2 }
  0xf5   :  { %v2192_v10 = vpop.f32.mrb[4].mxu0 }
  0xf6   :  { %v2196_v13 = vpop.f32.mrb[5].mxu0 }
  0xf7   :  { %v308_v17 = vpop.f32.mrb[6].mxu0 }
  0xf8   :  { %v241_v14 = vpop.f32.mrb[4].mxu1  ;;  %v2201_v39 = vadd.f32 %v308_v17, %v2190_v9  ;;  %v310_v49 = vpop.f32.mrb[7].mxu0 }
  0xf9   :  { %v2198_v21 = vadd.f32 %v241_v14, %v124_v61  ;;  %v243_v30 = vpop.f32.mrb[5].mxu1  ;;  %v2206_v52 = vadd.f32 %v310_v49, %v2194_v11 }
  0xfa   :  { %v2203_v50 = vadd.f32 %v243_v30, %v128_v2  ;;  %v245_v51 = vpop.f32.mrb[6].mxu1 }
  0xfb   :  { %v2208_v53 = vadd.f32 %v245_v51, %v124_v61  ;;  %v247_v54 = vpop.f32.mrb[7].mxu1 }
  0xfc   :  { %v2210_v55 = vadd.f32 %v247_v54, %v128_v2 }
  0xfd   :  { %v314_v56 = vpop.f32.mrb[8].mxu0 }
  0xfe   :  { %2597 = vst [vmem:[#allocation14_spill] sm:$0xff] %v2210_v55  ;;  %v2213_v57 = vadd.f32 %v314_v56, %v2190_v9  ;;  %v316_v58 = vpop.f32.mrb[9].mxu0 }
  0xff   :  { %v2216_v63 = vadd.f32 %v316_v58, %v2194_v11  ;;  %v318_v0 = vpop.f32.mrb[10].mxu0 }
 0x100   :  { %v251_v60 = vpop.f32.mrb[8].mxu1  ;;  %v2221_v6 = vadd.f32 %v318_v0, %v2190_v9  ;;  %v320_v14 = vpop.f32.mrb[11].mxu0 }
 0x101   :  { %v2218_v3 = vadd.f32 %v251_v60, %v124_v61  ;;  %v253_v4 = vpop.f32.mrb[9].mxu1  ;;  %v2226_v49 = vadd.f32 %v320_v14, %v2194_v11 }
 0x102   :  { %2599 = vst [vmem:[#allocation16_spill] sm:$0xff] %v2221_v6  ;;  %v2223_v17 = vadd.f32 %v253_v4, %v128_v2  ;;  %v255_v30 = vpop.f32.mrb[10].mxu1 }
 0x103   :  { %2598 = vst [vmem:[#allocation15_spill] sm:$0xff] %v2218_v3  ;;  %2601 = vst [vmem:[#allocation18_spill] sm:$0xff] %v2226_v49  ;;  %v2228_v51 = vadd.f32 %v255_v30, %v124_v61  ;;  %v257_v54 = vpop.f32.mrb[11].mxu1 }
 0x104   :  { %2600 = vst [vmem:[#allocation17_spill] sm:$0xff] %v2223_v17  ;;  %v2230_v56 = vadd.f32 %v257_v54, %v128_v2 }
 0x105   :  { %2602 = vst [vmem:[#allocation19_spill] sm:$0xff] %v2228_v51  ;;  %v324_v58 = vpop.f32.mrb[12].mxu0 }
 0x106   :  { %2603 = vst [vmem:[#allocation20_spill] sm:$0xff] %v2230_v56  ;;  %v2233_v60 = vadd.f32 %v324_v58, %v2190_v9  ;;  %v326_v1 = vpop.f32.mrb[13].mxu0 }
 0x107   :  { %v2236_v0 = vadd.f32 %v326_v1, %v2194_v11  ;;  %v328_v4 = vpop.f32.mrb[14].mxu0 }
 0x108   :  { %2604 = vst [vmem:[#allocation21_spill] sm:$0xff] %v2233_v60  ;;  %v261_v3 = vpop.f32.mrb[12].mxu1  ;;  %v2241_v14 = vadd.f32 %v328_v4, %v2190_v9  ;;  %v330_v30 = vpop.f32.mrb[15].mxu0  ;;  %v234_v4 = vadd.f32 %v233_v62, %v128_v2  ;;  %v305_v62 = vadd.f32 %v2192_v10, %v2190_v9 }
 0x109   :  { %2605 = vst [vmem:[#allocation22_spill] sm:$0xff] %v2236_v0  ;;  %v2238_v17 = vadd.f32 %v261_v3, %v124_v61  ;;  %v263_v55 = vpop.f32.mrb[13].mxu1  ;;  %v2246_v56 = vadd.f32 %v330_v30, %v2194_v11  ;;  %v232_v0 = vadd.f32 %v231_v59, %v124_v61 }
 0x10a   :  { %2607 = vst [vmem:[#allocation24_spill] sm:$0xff] %v2241_v14  ;;  %v2243_v51 = vadd.f32 %v263_v55, %v128_v2  ;;  %v265_v54 = vpop.f32.mrb[14].mxu1 }
 0x10b   :  { %2606 = vst [vmem:[#allocation23_spill] sm:$0xff] %v2238_v17  ;;  %v2248_v58 = vadd.f32 %v265_v54, %v124_v61  ;;  %v267_v60 = vpop.f32.mrb[15].mxu1 }
 0x10c   :  { %2608 = vst [vmem:[#allocation25_spill] sm:$0xff] %v2243_v51  ;;  %v2250_v49 = vadd.f32 %v267_v60, %v128_v2  ;;  %v307_v2 = vadd.f32 %v2196_v13, %v2194_v11 }
 0x10d   :  { %2609 = vst [vmem:[#allocation26_spill] sm:$0xff] %v2248_v58  ;;  %v334_v1 = vpop.f32.mrb[16].mxu0 }
 0x10e   :  { %2610 = vst [vmem:[#allocation27_spill] sm:$0xff] %v2250_v49  ;;  %v2253_v3 = vadd.f32 %v334_v1, %v2190_v9  ;;  %v336_v17 = vpop.f32.mrb[17].mxu0 }
 0x10f   :  { %v2256_v55 = vadd.f32 %v336_v17, %v2194_v11  ;;  %v338_v51 = vpop.f32.mrb[18].mxu0 }
 0x110   :  { %2611 = vst [vmem:[#allocation28_spill] sm:$0xff] %v2253_v3  ;;  %v611_v14 = vpop.f32.mrb[16].mxu1  ;;  %v2259_v54 = vadd.f32 %v338_v51, %v2190_v9  ;;  %v340_v58 = vpop.f32.mrb[19].mxu0 }
 0x111   :  { %v659_v6 = vadd.f32 %v611_v14, %v232_v0  ;;  %v613_v30 = vpop.f32.mrb[17].mxu1  ;;  %v2262_v59 = vadd.f32 %v340_v58, %v2194_v11 }
 0x112   :  { %v660_v60 = vadd.f32 %v613_v30, %v234_v4  ;;  %v615_v49 = vpop.f32.mrb[18].mxu1 }
 0x113   :  { %2612 = vst [vmem:[#allocation29_spill] sm:$0xff] %v2262_v59  ;;  %v1607_v61 = vmul.f32 -1.442695, %v659_v6  ;;  %v616_v1 = vpop.f32.mrb[19].mxu1 }
 0x114   :  { %v1608_v3 = vmul.f32 -1.442695, %v660_v60 }
 0x115   :  { %1704 = vpow2.f32 %v1607_v61  ;;  %v652_v17 = vpop.f32.mrb[20].mxu0 }
 0x116   :  { %1706 = vpow2.f32 %v1608_v3  ;;  %v661_v51 = vadd.f32 %v652_v17, %v305_v62  ;;  %v654_v0 = vpop.f32.mrb[21].mxu0 }
 0x117   :  { %v662_v14 = vadd.f32 %v654_v0, %v307_v2  ;;  %v656_v4 = vpop.f32.mrb[22].mxu0 }
 0x118   :  { %v657_v49 = vpop.f32.mrb[23].mxu0 }
 0x119   :  { %v1609_v30 = vmul.f32 -1.442695, %v662_v14 }
 0x11b   :  { %1708 = vpow2.f32 %v1609_v30 }
 0x11c   :  { %1710 = vtanh.f32 %v661_v51 }
 0x11f   :  { %v1705_v58 = vpop.eup %1704 }
 0x120   :  { %v1707_v59 = vpop.eup %1706  ;;  %v666_v6 = vadd.f32 1.0, %v1705_v58 }
 0x121   :  { %v672_v60 = vadd.f32 1.0, %v1707_v59  ;;  %v2613_v59 = vmov 0  }
 0x122   :  { %1712 = vrcp.f32 %v666_v6 }
 0x123   :  { %1714 = vrcp.f32 %v672_v60 }
 0x125   :  { %v1709_v9 = vpop.eup %1708 }
 0x126   :  { %v1711_v10 = vpop.eup %1710  ;;  %v679_v3 = vadd.f32 1.0, %v1709_v9 }
 0x128   :  { %1716 = vrcp.f32 %v679_v3 }
 0x12c   :  { %v1713_v61 = vpop.eup %1712 }
 0x12d   :  { %v1715_v11 = vpop.eup %1714  ;;  %v683_v13 = vmul.f32 %v1713_v61, %v1711_v10 }
 0x12e   :  { %v682_v1 = vmul.f32 0.0, %v1715_v11 }
 0x130   :  { %v2268_v62 = vadd.f32 %v683_v13, %v682_v1 }
 0x132   :  { %1718 = vtanh.f32 %v2268_v62  ;;  %v1717_v2 = vpop.eup %1716 }
 0x13c   :  { %v1719_v17 = vpop.eup %1718 }
 0x13d   :  { %v686_v0 = vmul.f32 %v1719_v17, %v1717_v2 }
 0x13f   :  { %v694_v14 = vpack.c.bf16 %v686_v0, %v686_v0 }
 0x141   :  { %728 = vmatmul.mubr.bf16.vlgmr.msra.gmra.mrb[20].mxu1 %v694_v14  ;;  %769 = vmatmul.mubr.bf16.vlgmr.msra.gmra.mrb[24].mxu0 %v694_v14 }
 0x142   :  { %814 = vmatpush1.bf16.msra.mxu1 %v2022_v12  ;;  %855 = vmatpush1.bf16.msra.mxu0 %v2039_v19 }
 0x143   :  { %815 = vmatprep.subr.bf16.mxu1 %v2024_v15  ;;  %856 = vmatprep.subr.bf16.mxu0 %v2046_v22 }
 0x144   :  { %845 = vmatprep.mubr.bf16.mxu1 %v2613_v59  ;;  %886 = vmatprep.mubr.bf16.mxu0 %v2613_v59 }
 0x146   :  { %816 = vmatpush1.bf16.msra.mxu1 %v2034_v18  ;;  %857 = vmatpush1.bf16.msra.mxu0 %v2056_v25 }
 0x147   :  { %817 = vmatprep.subr.bf16.mxu1 %v2041_v20  ;;  %858 = vmatprep.subr.bf16.mxu0 %v2061_v26 }
 0x14a   :  { %818 = vmatpush1.bf16.msra.mxu1 %v2049_v23  ;;  %859 = vmatpush1.bf16.msra.mxu0 %v2071_v29 }
 0x14b   :  { %819 = vmatprep.subr.bf16.mxu1 %v2053_v24  ;;  %860 = vmatprep.subr.bf16.mxu0 %v2077_v31 }
 0x14e   :  { %820 = vmatpush1.bf16.msra.mxu1 %v2064_v27  ;;  %861 = vmatpush1.bf16.msra.mxu0 %v2087_v34 }
 0x14f   :  { %821 = vmatprep.subr.bf16.mxu1 %v2068_v28  ;;  %862 = vmatprep.subr.bf16.mxu0 %v2092_v35 }
 0x152   :  { %822 = vmatpush1.bf16.msra.mxu1 %v2080_v32  ;;  %863 = vmatpush1.bf16.msra.mxu0 %v2102_v38 }
 0x153   :  { %823 = vmatprep.subr.bf16.mxu1 %v2084_v33  ;;  %864 = vmatprep.subr.bf16.mxu0 %v2108_v40 }
 0x156   :  { %824 = vmatpush1.bf16.msra.mxu1 %v2095_v36  ;;  %865 = vmatpush1.bf16.msra.mxu0 %v2118_v43 }
 0x157   :  { %825 = vmatprep.subr.bf16.mxu1 %v2099_v37  ;;  %866 = vmatprep.subr.bf16.mxu0 %v2123_v44 }
 0x15a   :  { %826 = vmatpush1.bf16.msra.mxu1 %v2111_v41  ;;  %867 = vmatpush1.bf16.msra.mxu0 %v2131_v46 }
 0x15b   :  { %827 = vmatprep.subr.bf16.mxu1 %v2115_v42  ;;  %868 = vmatprep.subr.bf16.mxu0 %v2134_v47 }
 0x15e   :  { %828 = vmatpush1.bf16.msra.mxu1 %v2126_v45  ;;  %869 = vmatpush1.bf16.msra.mxu0 %v2140_v48 }
 0x15f   :  { %931 = vmatprep.subr.bf16.mxu1 %v2012_v8  ;;  %972 = vmatprep.subr.bf16.mxu0 %v2027_v16 }
 0x214   :  { %v729_v51 = vpop.f32.mrb[20].mxu1  ;;  %v770_v4 = vpop.f32.mrb[24].mxu0 }
 0x215   :  { %v777_v49 = vadd.f32 %v729_v51, %v2186_v5  ;;  %v779_v30 = vadd.f32 %v770_v4, %v2201_v39  ;;  %v731_v58 = vpop.f32.mrb[21].mxu1  ;;  %v772_v6 = vpop.f32.mrb[25].mxu0 }
 0x216   :  { %v778_v60 = vadd.f32 %v731_v58, %v2188_v7  ;;  %v780_v9 = vadd.f32 %v772_v6, %v2206_v52  ;;  %v733_v10 = vpop.f32.mrb[22].mxu1  ;;  %v774_v61 = vpop.f32.mrb[26].mxu0 }
 0x217   :  { %v1610_v11 = vmul.f32 -1.442695, %v777_v49  ;;  %v734_v13 = vpop.f32.mrb[23].mxu1  ;;  %v775_v3 = vpop.f32.mrb[27].mxu0 }
 0x218   :  { %v1611_v1 = vmul.f32 -1.442695, %v778_v60  ;;  %v1612_v2 = vmul.f32 -1.442695, %v780_v9 }
 0x219   :  { %1720 = vpow2.f32 %v1610_v11 }
 0x21a   :  { %1722 = vpow2.f32 %v1611_v1 }
 0x21b   :  { %1724 = vpow2.f32 %v1612_v2 }
 0x21c   :  { %1726 = vtanh.f32 %v779_v30 }
 0x223   :  { %v1721_v17 = vpop.eup %1720 }
 0x224   :  { %v1723_v0 = vpop.eup %1722  ;;  %v784_v5 = vadd.f32 1.0, %v1721_v17 }
 0x225   :  { %v790_v39 = vadd.f32 1.0, %v1723_v0  ;;  %v1725_v7 = vpop.eup %1724 }
 0x226   :  { %1728 = vrcp.f32 %v784_v5  ;;  %v1727_v14 = vpop.eup %1726  ;;  %v797_v49 = vadd.f32 1.0, %v1725_v7 }
 0x227   :  { %1730 = vrcp.f32 %v790_v39 }
 0x228   :  { %1732 = vrcp.f32 %v797_v49 }
 0x230   :  { %v1729_v52 = vpop.eup %1728 }
 0x231   :  { %v1731_v51 = vpop.eup %1730  ;;  %v801_v4 = vmul.f32 %v1729_v52, %v1727_v14 }
 0x232   :  { %v800_v58 = vmul.f32 %v1731_v51, %v2268_v62  ;;  %v1733_v60 = vpop.eup %1732 }
 0x234   :  { %v2310_v6 = vadd.f32 %v801_v4, %v800_v58 }
 0x236   :  { %1734 = vtanh.f32 %v2310_v6 }
 0x240   :  { %v1735_v9 = vpop.eup %1734 }
 0x241   :  { %v804_v10 = vmul.f32 %v1735_v9, %v1733_v60 }
 0x243   :  { %v812_v30 = vpack.c.bf16 %v804_v10, %v804_v10 }
 0x245   :  { %846 = vmatmul.mubr.bf16.vlgmr.msra.gmra.mrb[24].mxu1 %v812_v30  ;;  %887 = vmatmul.mubr.bf16.vlgmr.msra.gmra.mrb[28].mxu0 %v812_v30 }
 0x246   :  { %932 = vmatpush1.bf16.msra.mxu1 %v2022_v12  ;;  %973 = vmatpush1.bf16.msra.mxu0 %v2039_v19 }
 0x247   :  { %933 = vmatprep.subr.bf16.mxu1 %v2024_v15  ;;  %974 = vmatprep.subr.bf16.mxu0 %v2046_v22 }
 0x248   :  { %963 = vmatprep.mubr.bf16.mxu1 %v2613_v59  ;;  %1004 = vmatprep.mubr.bf16.mxu0 %v2613_v59 }
 0x24a   :  { %934 = vmatpush1.bf16.msra.mxu1 %v2034_v18  ;;  %975 = vmatpush1.bf16.msra.mxu0 %v2056_v25 }
 0x24b   :  { %935 = vmatprep.subr.bf16.mxu1 %v2041_v20  ;;  %976 = vmatprep.subr.bf16.mxu0 %v2061_v26 }
 0x24e   :  { %936 = vmatpush1.bf16.msra.mxu1 %v2049_v23  ;;  %977 = vmatpush1.bf16.msra.mxu0 %v2071_v29 }
 0x24f   :  { %937 = vmatprep.subr.bf16.mxu1 %v2053_v24  ;;  %978 = vmatprep.subr.bf16.mxu0 %v2077_v31 }
 0x252   :  { %938 = vmatpush1.bf16.msra.mxu1 %v2064_v27  ;;  %979 = vmatpush1.bf16.msra.mxu0 %v2087_v34 }
 0x253   :  { %939 = vmatprep.subr.bf16.mxu1 %v2068_v28  ;;  %980 = vmatprep.subr.bf16.mxu0 %v2092_v35 }
 0x256   :  { %940 = vmatpush1.bf16.msra.mxu1 %v2080_v32  ;;  %981 = vmatpush1.bf16.msra.mxu0 %v2102_v38 }
 0x257   :  { %941 = vmatprep.subr.bf16.mxu1 %v2084_v33  ;;  %982 = vmatprep.subr.bf16.mxu0 %v2108_v40 }
 0x25a   :  { %942 = vmatpush1.bf16.msra.mxu1 %v2095_v36  ;;  %983 = vmatpush1.bf16.msra.mxu0 %v2118_v43 }
 0x25b   :  { %943 = vmatprep.subr.bf16.mxu1 %v2099_v37  ;;  %984 = vmatprep.subr.bf16.mxu0 %v2123_v44 }
 0x25e   :  { %944 = vmatpush1.bf16.msra.mxu1 %v2111_v41  ;;  %985 = vmatpush1.bf16.msra.mxu0 %v2131_v46 }
 0x25f   :  { %945 = vmatprep.subr.bf16.mxu1 %v2115_v42  ;;  %986 = vmatprep.subr.bf16.mxu0 %v2134_v47 }
 0x262   :  { %946 = vmatpush1.bf16.msra.mxu1 %v2126_v45  ;;  %987 = vmatpush1.bf16.msra.mxu0 %v2140_v48 }
 0x263   :  { %1049 = vmatprep.subr.bf16.mxu1 %v2012_v8  ;;  %1090 = vmatprep.subr.bf16.mxu0 %v2027_v16 }
 0x318   :  { %v847_v62 = vpop.f32.mrb[24].mxu1  ;;  %v888_v61 = vpop.f32.mrb[28].mxu0 }
 0x319   :  { %v895_v11 = vadd.f32 %v847_v62, %v2198_v21  ;;  %v897_v13 = vadd.f32 %v888_v61, %v2213_v57  ;;  %v849_v3 = vpop.f32.mrb[25].mxu1  ;;  %v890_v1 = vpop.f32.mrb[29].mxu0 }
 0x31a   :  { %v896_v2 = vadd.f32 %v849_v3, %v2203_v50  ;;  %v898_v17 = vadd.f32 %v890_v1, %v2216_v63  ;;  %v851_v0 = vpop.f32.mrb[26].mxu1  ;;  %v892_v5 = vpop.f32.mrb[30].mxu0 }
 0x31b   :  { %v1613_v39 = vmul.f32 -1.442695, %v895_v11  ;;  %v852_v7 = vpop.f32.mrb[27].mxu1  ;;  %v893_v14 = vpop.f32.mrb[31].mxu0 }
 0x31c   :  { %v1614_v52 = vmul.f32 -1.442695, %v896_v2  ;;  %v1615_v51 = vmul.f32 -1.442695, %v898_v17  ;;  %v2614_v17 = vld [vmem:[#allocation16_spill] sm:$0xff]  ;;  %v2615_v7 = vld [vmem:[#allocation14_spill] sm:$0xff] }
 0x31d   :  { %1736 = vpow2.f32 %v1613_v39 }
 0x31e   :  { %1738 = vpow2.f32 %v1614_v52  ;;  %v2616_v52 = vld [vmem:[#allocation18_spill] sm:$0xff] }
 0x31f   :  { %1740 = vpow2.f32 %v1615_v51 }
 0x320   :  { %1742 = vtanh.f32 %v897_v13 }
 0x327   :  { %v1737_v4 = vpop.eup %1736 }
 0x328   :  { %v1739_v49 = vpop.eup %1738  ;;  %v902_v21 = vadd.f32 1.0, %v1737_v4 }
 0x329   :  { %v908_v57 = vadd.f32 1.0, %v1739_v49  ;;  %v1741_v50 = vpop.eup %1740 }
 0x32a   :  { %1744 = vrcp.f32 %v902_v21  ;;  %v1743_v58 = vpop.eup %1742  ;;  %v915_v10 = vadd.f32 1.0, %v1741_v50 }
 0x32b   :  { %1746 = vrcp.f32 %v908_v57 }
 0x32c   :  { %1748 = vrcp.f32 %v915_v10 }
 0x334   :  { %v1745_v63 = vpop.eup %1744 }
 0x335   :  { %v1747_v60 = vpop.eup %1746  ;;  %v919_v9 = vmul.f32 %v1745_v63, %v1743_v58 }
 0x336   :  { %v918_v30 = vmul.f32 %v1747_v60, %v2310_v6  ;;  %v1749_v61 = vpop.eup %1748 }
 0x338   :  { %v2352_v62 = vadd.f32 %v919_v9, %v918_v30 }
 0x33a   :  { %1750 = vtanh.f32 %v2352_v62 }
 0x344   :  { %v1751_v11 = vpop.eup %1750 }
 0x345   :  { %v922_v3 = vmul.f32 %v1751_v11, %v1749_v61 }
 0x347   :  { %v930_v13 = vpack.c.bf16 %v922_v3, %v922_v3 }
 0x349   :  { %964 = vmatmul.mubr.bf16.vlgmr.msra.gmra.mrb[28].mxu1 %v930_v13  ;;  %1005 = vmatmul.mubr.bf16.vlgmr.msra.gmra.mrb[32].mxu0 %v930_v13 }
 0x34a   :  { %1050 = vmatpush1.bf16.msra.mxu1 %v2022_v12  ;;  %1091 = vmatpush1.bf16.msra.mxu0 %v2039_v19 }
 0x34b   :  { %1051 = vmatprep.subr.bf16.mxu1 %v2024_v15  ;;  %1092 = vmatprep.subr.bf16.mxu0 %v2046_v22 }
 0x34c   :  { %1081 = vmatprep.mubr.bf16.mxu1 %v2613_v59  ;;  %1122 = vmatprep.mubr.bf16.mxu0 %v2613_v59 }
 0x34e   :  { %1052 = vmatpush1.bf16.msra.mxu1 %v2034_v18  ;;  %1093 = vmatpush1.bf16.msra.mxu0 %v2056_v25 }
 0x34f   :  { %1053 = vmatprep.subr.bf16.mxu1 %v2041_v20  ;;  %1094 = vmatprep.subr.bf16.mxu0 %v2061_v26 }
 0x352   :  { %1054 = vmatpush1.bf16.msra.mxu1 %v2049_v23  ;;  %1095 = vmatpush1.bf16.msra.mxu0 %v2071_v29 }
 0x353   :  { %1055 = vmatprep.subr.bf16.mxu1 %v2053_v24  ;;  %1096 = vmatprep.subr.bf16.mxu0 %v2077_v31 }
 0x356   :  { %1056 = vmatpush1.bf16.msra.mxu1 %v2064_v27  ;;  %1097 = vmatpush1.bf16.msra.mxu0 %v2087_v34 }
 0x357   :  { %1057 = vmatprep.subr.bf16.mxu1 %v2068_v28  ;;  %1098 = vmatprep.subr.bf16.mxu0 %v2092_v35 }
 0x35a   :  { %1058 = vmatpush1.bf16.msra.mxu1 %v2080_v32  ;;  %1099 = vmatpush1.bf16.msra.mxu0 %v2102_v38 }
 0x35b   :  { %1059 = vmatprep.subr.bf16.mxu1 %v2084_v33  ;;  %1100 = vmatprep.subr.bf16.mxu0 %v2108_v40 }
 0x35e   :  { %1060 = vmatpush1.bf16.msra.mxu1 %v2095_v36  ;;  %1101 = vmatpush1.bf16.msra.mxu0 %v2118_v43 }
 0x35f   :  { %1061 = vmatprep.subr.bf16.mxu1 %v2099_v37  ;;  %1102 = vmatprep.subr.bf16.mxu0 %v2123_v44 }
 0x362   :  { %1062 = vmatpush1.bf16.msra.mxu1 %v2111_v41  ;;  %1103 = vmatpush1.bf16.msra.mxu0 %v2131_v46 }
 0x363   :  { %1063 = vmatprep.subr.bf16.mxu1 %v2115_v42  ;;  %1104 = vmatprep.subr.bf16.mxu0 %v2134_v47 }
 0x366   :  { %1064 = vmatpush1.bf16.msra.mxu1 %v2126_v45  ;;  %1105 = vmatpush1.bf16.msra.mxu0 %v2140_v48 }
 0x367   :  { %1167 = vmatprep.subr.bf16.mxu1 %v2012_v8  ;;  %1208 = vmatprep.subr.bf16.mxu0 %v2027_v16 }
 0x41c   :  { %v965_v6 = vpop.f32.mrb[28].mxu1  ;;  %v1006_v1 = vpop.f32.mrb[32].mxu0 }
 0x41d   :  { %v1013_v2 = vadd.f32 %v965_v6, %v2208_v53  ;;  %v1015_v0 = vadd.f32 %v1006_v1, %v2614_v17  ;;  %v967_v5 = vpop.f32.mrb[29].mxu1  ;;  %v1008_v39 = vpop.f32.mrb[33].mxu0 }
 0x41e   :  { %v1014_v14 = vadd.f32 %v967_v5, %v2615_v7  ;;  %v1016_v51 = vadd.f32 %v1008_v39, %v2616_v52  ;;  %v969_v4 = vpop.f32.mrb[30].mxu1  ;;  %v1010_v49 = vpop.f32.mrb[34].mxu0 }
 0x41f   :  { %v1616_v21 = vmul.f32 -1.442695, %v1013_v2  ;;  %v970_v57 = vpop.f32.mrb[31].mxu1  ;;  %v1011_v50 = vpop.f32.mrb[35].mxu0 }
 0x420   :  { %v1617_v8 = vmul.f32 -1.442695, %v1014_v14  ;;  %v1618_v16 = vmul.f32 -1.442695, %v1016_v51 }
 0x421   :  { %1752 = vpow2.f32 %v1616_v21 }
 0x422   :  { %1754 = vpow2.f32 %v1617_v8 }
 0x423   :  { %1756 = vpow2.f32 %v1618_v16 }
 0x424   :  { %1758 = vtanh.f32 %v1015_v0 }
 0x42b   :  { %v1753_v58 = vpop.eup %1752 }
 0x42c   :  { %v1755_v63 = vpop.eup %1754  ;;  %v1020_v53 = vadd.f32 1.0, %v1753_v58 }
 0x42d   :  { %v1026_v60 = vadd.f32 1.0, %v1755_v63  ;;  %v1757_v9 = vpop.eup %1756  ;;  %v2443_v63 = vld [vmem:[#allocation5] ss:$16 sps:$4 sm:$0xff]  }
 0x42e   :  { %1760 = vrcp.f32 %v1020_v53  ;;  %v1759_v10 = vpop.eup %1758  ;;  %v1033_v3 = vadd.f32 1.0, %v1757_v9  ;;  %v2446_v53 = vld [vmem:[#allocation5 + $0x8] ss:$16 sps:$4 sm:$0xff]   ;;  %v2452_v9 = vld [vmem:[#allocation5 + $0x2c] ss:$16 sps:$4 sm:$0xff]  }
 0x42f   :  { %1762 = vrcp.f32 %v1026_v60  ;;  %v2449_v60 = vld [vmem:[#allocation5 + $0x24] ss:$16 sps:$4 sm:$0xff]  }
 0x430   :  { %1764 = vrcp.f32 %v1033_v3  ;;  %v2469_v3 = vld [vmem:[#allocation5 + $0x40] ss:$16 sps:$4 sm:$0xff]  }
 0x438   :  { %v1761_v30 = vpop.eup %1760 }
 0x439   :  { %v1763_v61 = vpop.eup %1762  ;;  %v1037_v11 = vmul.f32 %v1761_v30, %v1759_v10  ;;  %v2457_v10 = vld [vmem:[#allocation5 + $0x20] ss:$16 sps:$4 sm:$0xff]   ;;  %v2460_v30 = vld [vmem:[#allocation5 + $0x28] ss:$16 sps:$4 sm:$0xff]  }
 0x43a   :  { %v1036_v13 = vmul.f32 %v1763_v61, %v2352_v62  ;;  %v1765_v1 = vpop.eup %1764  ;;  %v2463_v61 = vld [vmem:[#allocation5 + $0x44] ss:$16 sps:$4 sm:$0xff]  }
 0x43c   :  { %v2394_v6 = vadd.f32 %v1037_v11, %v1036_v13  ;;  %v2466_v11 = vld [vmem:[#allocation5 + $0x4c] ss:$16 sps:$4 sm:$0xff]   ;;  %v2472_v13 = vld [vmem:[#allocation5 + $0x48] ss:$16 sps:$4 sm:$0xff]  }
 0x43e   :  { %1766 = vtanh.f32 %v2394_v6 }
 0x448   :  { %v1767_v2 = vpop.eup %1766 }
 0x449   :  { %v1040_v17 = vmul.f32 %v1767_v2, %v1765_v1  ;;  %v2478_v1 = vld [vmem:[#allocation5 + $0x6c] ss:$16 sps:$4 sm:$0xff]   ;;  %v2481_v2 = vld [vmem:[#allocation5 + $0x60] ss:$16 sps:$4 sm:$0xff]  }
 0x44b   :  { %v1048_v0 = vpack.c.bf16 %v1040_v17, %v1040_v17  ;;  %v2484_v17 = vld [vmem:[#allocation5 + $0x68] ss:$16 sps:$4 sm:$0xff]  }
 0x44d   :  { %1082 = vmatmul.mubr.bf16.vlgmr.msra.gmra.mrb[32].mxu1 %v1048_v0  ;;  %1123 = vmatmul.mubr.bf16.vlgmr.msra.gmra.mrb[36].mxu0 %v1048_v0  ;;  %v2487_v0 = vld [vmem:[#allocation5 + $0x84] ss:$16 sps:$4 sm:$0xff]  }
 0x44e   :  { %1168 = vmatpush1.bf16.msra.mxu1 %v2022_v12  ;;  %1209 = vmatpush1.bf16.msra.mxu0 %v2039_v19  ;;  %v2429_v12 = vld [vmem:[#allocation5 + $0x4] ss:$16 sps:$4 sm:$0xff]  }
 0x44f   :  { %1169 = vmatprep.subr.bf16.mxu1 %v2024_v15  ;;  %1210 = vmatprep.subr.bf16.mxu0 %v2046_v22  ;;  %v2432_v15 = vld [vmem:[#allocation5 + $0xc] ss:$16 sps:$4 sm:$0xff]  }
 0x450   :  { %1199 = vmatprep.mubr.bf16.mxu1 %v2613_v59  ;;  %1240 = vmatprep.mubr.bf16.mxu0 %v2613_v59 }
 0x452   :  { %1170 = vmatpush1.bf16.msra.mxu1 %v2034_v18  ;;  %1211 = vmatpush1.bf16.msra.mxu0 %v2056_v25 }
 0x453   :  { %1171 = vmatprep.subr.bf16.mxu1 %v2041_v20  ;;  %1212 = vmatprep.subr.bf16.mxu0 %v2061_v26  ;;  %v2617_v20 = vld [vmem:[#allocation15_spill] sm:$0xff] }
 0x456   :  { %1172 = vmatpush1.bf16.msra.mxu1 %v2049_v23  ;;  %1213 = vmatpush1.bf16.msra.mxu0 %v2071_v29  ;;  %v2618_v23 = vld [vmem:[#allocation21_spill] sm:$0xff]  ;;  %v2620_v29 = vld [vmem:[#allocation22_spill] sm:$0xff] }
 0x457   :  { %1173 = vmatprep.subr.bf16.mxu1 %v2053_v24  ;;  %1214 = vmatprep.subr.bf16.mxu0 %v2077_v31 }
 0x45a   :  { %1174 = vmatpush1.bf16.msra.mxu1 %v2064_v27  ;;  %1215 = vmatpush1.bf16.msra.mxu0 %v2087_v34  ;;  %v2619_v27 = vld [vmem:[#allocation17_spill] sm:$0xff] }
 0x45b   :  { %1175 = vmatprep.subr.bf16.mxu1 %v2068_v28  ;;  %1216 = vmatprep.subr.bf16.mxu0 %v2092_v35 }
 0x45e   :  { %1176 = vmatpush1.bf16.msra.mxu1 %v2080_v32  ;;  %1217 = vmatpush1.bf16.msra.mxu0 %v2102_v38 }
 0x45f   :  { %1177 = vmatprep.subr.bf16.mxu1 %v2084_v33  ;;  %1218 = vmatprep.subr.bf16.mxu0 %v2108_v40 }
 0x462   :  { %1178 = vmatpush1.bf16.msra.mxu1 %v2095_v36  ;;  %1219 = vmatpush1.bf16.msra.mxu0 %v2118_v43 }
 0x463   :  { %1179 = vmatprep.subr.bf16.mxu1 %v2099_v37  ;;  %1220 = vmatprep.subr.bf16.mxu0 %v2123_v44 }
 0x466   :  { %1180 = vmatpush1.bf16.msra.mxu1 %v2111_v41  ;;  %1221 = vmatpush1.bf16.msra.mxu0 %v2131_v46 }
 0x467   :  { %1181 = vmatprep.subr.bf16.mxu1 %v2115_v42  ;;  %1222 = vmatprep.subr.bf16.mxu0 %v2134_v47 }
 0x46a   :  { %1182 = vmatpush1.bf16.msra.mxu1 %v2126_v45  ;;  %1223 = vmatpush1.bf16.msra.mxu0 %v2140_v48 }
 0x46b   :  { %1285 = vmatprep.subr.bf16.mxu1 %v2429_v12  ;;  %1326 = vmatprep.subr.bf16.mxu0 %v2432_v15 }
 0x520   :  { %v1083_v18 = vpop.f32.mrb[32].mxu1  ;;  %v1124_v19 = vpop.f32.mrb[36].mxu0 }
 0x521   :  { %v1131_v22 = vadd.f32 %v1083_v18, %v2617_v20  ;;  %v1133_v24 = vadd.f32 %v1124_v19, %v2618_v23  ;;  %v1085_v25 = vpop.f32.mrb[33].mxu1  ;;  %v1126_v26 = vpop.f32.mrb[37].mxu0  ;;  %v2490_v18 = vld [vmem:[#allocation5 + $0x8c] ss:$16 sps:$4 sm:$0xff]   ;;  %v2493_v19 = vld [vmem:[#allocation5 + $0x80] ss:$16 sps:$4 sm:$0xff]  }
 0x522   :  { %v1132_v28 = vadd.f32 %v1085_v25, %v2619_v27  ;;  %v1134_v31 = vadd.f32 %v1126_v26, %v2620_v29  ;;  %v1087_v32 = vpop.f32.mrb[34].mxu1  ;;  %v1128_v33 = vpop.f32.mrb[38].mxu0  ;;  %v2497_v20 = vld [vmem:[#allocation5 + $0xa4] ss:$16 sps:$4 sm:$0xff]  }
 0x523   :  { %v1619_v34 = vmul.f32 -1.442695, %v1131_v22  ;;  %v1088_v35 = vpop.f32.mrb[35].mxu1  ;;  %v1129_v36 = vpop.f32.mrb[39].mxu0  ;;  %v2501_v22 = vld [vmem:[#allocation5 + $0xa0] ss:$16 sps:$4 sm:$0xff]  }
 0x524   :  { %v1620_v37 = vmul.f32 -1.442695, %v1132_v28  ;;  %v1621_v41 = vmul.f32 -1.442695, %v1134_v31  ;;  %v2505_v23 = vld [vmem:[#allocation5 + $0xc4] ss:$16 sps:$4 sm:$0xff]  }
 0x525   :  { %1768 = vpow2.f32 %v1619_v34  ;;  %v2622_v26 = vld [vmem:[#allocation24_spill] sm:$0xff] }
 0x526   :  { %1770 = vpow2.f32 %v1620_v37  ;;  %v2623_v29 = vld [vmem:[#allocation20_spill] sm:$0xff] }
 0x527   :  { %1772 = vpow2.f32 %v1621_v41 }
 0x528   :  { %1774 = vtanh.f32 %v1133_v24  ;;  %v2509_v24 = vld [vmem:[#allocation5 + $0xc0] ss:$16 sps:$4 sm:$0xff]  }
 0x52f   :  { %v1769_v42 = vpop.eup %1768 }
 0x530   :  { %v1771_v62 = vpop.eup %1770  ;;  %v1138_v5 = vadd.f32 1.0, %v1769_v42 }
 0x531   :  { %v1144_v39 = vadd.f32 1.0, %v1771_v62  ;;  %v1773_v7 = vpop.eup %1772 }
 0x532   :  { %1776 = vrcp.f32 %v1138_v5  ;;  %v1775_v14 = vpop.eup %1774  ;;  %v1151_v49 = vadd.f32 1.0, %v1773_v7 }
 0x533   :  { %1778 = vrcp.f32 %v1144_v39 }
 0x534   :  { %1780 = vrcp.f32 %v1151_v49 }
 0x53c   :  { %v1777_v52 = vpop.eup %1776 }
 0x53d   :  { %v1779_v51 = vpop.eup %1778  ;;  %v1155_v4 = vmul.f32 %v1777_v52, %v1775_v14 }
 0x53e   :  { %v1154_v21 = vmul.f32 %v1779_v51, %v2394_v6  ;;  %v1781_v50 = vpop.eup %1780  ;;  %v2475_v6 = vld [vmem:[#allocation5 + $0x64] ss:$16 sps:$4 sm:$0xff]  }
 0x540   :  { %v2440_v57 = vadd.f32 %v1155_v4, %v1154_v21 }
 0x542   :  { %1782 = vtanh.f32 %v2440_v57 }
 0x54c   :  { %v1783_v8 = vpop.eup %1782 }
 0x54d   :  { %v1158_v16 = vmul.f32 %v1783_v8, %v1781_v50  ;;  %v1858_v50 = vld [vmem:[#allocation5 + $0xa8] ss:$16 sps:$4 sm:$0xff]   ;;  %v1859_v8 = vld [vmem:[#allocation5 + $0xcc] ss:$16 sps:$4 sm:$0xff]  }
 0x54f   :  { %v1166_v58 = vpack.c.bf16 %v1158_v16, %v1158_v16  ;;  %v1860_v16 = vld [vmem:[#allocation5 + $0xc8] ss:$16 sps:$4 sm:$0xff]  }
 0x551   :  { %1200 = vmatmul.mubr.bf16.vlgmr.msra.gmra.mrb[36].mxu1 %v1166_v58  ;;  %1241 = vmatmul.mubr.bf16.vlgmr.msra.gmra.mrb[40].mxu0 %v1166_v58  ;;  %v1861_v58 = vld [vmem:[#allocation5 + $0xec] ss:$16 sps:$4 sm:$0xff]  }
 0x552   :  { %1286 = vmatpush1.bf16.msra.mxu1 %v2443_v63  ;;  %1327 = vmatpush1.bf16.msra.mxu0 %v2446_v53 }
 0x553   :  { %1287 = vmatprep.subr.bf16.mxu1 %v2449_v60  ;;  %1328 = vmatprep.subr.bf16.mxu0 %v2452_v9 }
 0x554   :  { %1317 = vmatprep.mubr.bf16.mxu1 %v2613_v59  ;;  %1358 = vmatprep.mubr.bf16.mxu0 %v2613_v59 }
 0x556   :  { %1288 = vmatpush1.bf16.msra.mxu1 %v2457_v10  ;;  %1329 = vmatpush1.bf16.msra.mxu0 %v2460_v30 }
 0x557   :  { %1289 = vmatprep.subr.bf16.mxu1 %v2463_v61  ;;  %1330 = vmatprep.subr.bf16.mxu0 %v2466_v11 }
 0x55a   :  { %1290 = vmatpush1.bf16.msra.mxu1 %v2469_v3  ;;  %1331 = vmatpush1.bf16.msra.mxu0 %v2472_v13 }
 0x55b   :  { %1291 = vmatprep.subr.bf16.mxu1 %v2475_v6  ;;  %1332 = vmatprep.subr.bf16.mxu0 %v2478_v1 }
 0x55e   :  { %1292 = vmatpush1.bf16.msra.mxu1 %v2481_v2  ;;  %1333 = vmatpush1.bf16.msra.mxu0 %v2484_v17 }
 0x55f   :  { %1293 = vmatprep.subr.bf16.mxu1 %v2487_v0  ;;  %1334 = vmatprep.subr.bf16.mxu0 %v2490_v18 }
 0x562   :  { %1294 = vmatpush1.bf16.msra.mxu1 %v2493_v19  ;;  %1335 = vmatpush1.bf16.msra.mxu0 %v2102_v38  ;;  %v2513_v38 = vld [vmem:[#allocation5 + $0xe4] ss:$16 sps:$4 sm:$0xff]  }
 0x563   :  { %1295 = vmatprep.subr.bf16.mxu1 %v2497_v20  ;;  %1336 = vmatprep.subr.bf16.mxu0 %v2108_v40 }
 0x566   :  { %1296 = vmatpush1.bf16.msra.mxu1 %v2501_v22  ;;  %1337 = vmatpush1.bf16.msra.mxu0 %v2118_v43 }
 0x567   :  { %1297 = vmatprep.subr.bf16.mxu1 %v2505_v23  ;;  %1338 = vmatprep.subr.bf16.mxu0 %v2123_v44  ;;  %v2621_v44 = vld [vmem:[#allocation19_spill] sm:$0xff] }
 0x56a   :  { %1298 = vmatpush1.bf16.msra.mxu1 %v2509_v24  ;;  %1339 = vmatpush1.bf16.msra.mxu0 %v2131_v46 }
 0x56b   :  { %1299 = vmatprep.subr.bf16.mxu1 %v2513_v38  ;;  %1340 = vmatprep.subr.bf16.mxu0 %v2134_v47 }
 0x56e   :  { %1300 = vmatpush1.bf16.msra.mxu1 %v2126_v45  ;;  %1341 = vmatpush1.bf16.msra.mxu0 %v2140_v48 }
 0x56f   :  { %1403 = vmatprep.subr.bf16.mxu1 %v2429_v12  ;;  %1444 = vmatprep.subr.bf16.mxu0 %v2432_v15 }
 0x624   :  { %v1201_v40 = vpop.f32.mrb[36].mxu1  ;;  %v1242_v43 = vpop.f32.mrb[40].mxu0 }
 0x625   :  { %v1249_v25 = vadd.f32 %v1201_v40, %v2621_v44  ;;  %v1251_v46 = vadd.f32 %v1242_v43, %v2622_v26  ;;  %v1203_v27 = vpop.f32.mrb[37].mxu1  ;;  %v1244_v28 = vpop.f32.mrb[41].mxu0 }
 0x626   :  { %v1250_v31 = vadd.f32 %v1203_v27, %v2623_v29  ;;  %v1252_v47 = vadd.f32 %v1244_v28, %v2246_v56  ;;  %v1205_v32 = vpop.f32.mrb[38].mxu1  ;;  %v1246_v45 = vpop.f32.mrb[42].mxu0 }
 0x627   :  { %v1622_v33 = vmul.f32 -1.442695, %v1249_v25  ;;  %v1206_v48 = vpop.f32.mrb[39].mxu1  ;;  %v1247_v34 = vpop.f32.mrb[43].mxu0 }
 0x628   :  { %v1623_v12 = vmul.f32 -1.442695, %v1250_v31  ;;  %v1624_v15 = vmul.f32 -1.442695, %v1252_v47 }
 0x629   :  { %1784 = vpow2.f32 %v1622_v33 }
 0x62a   :  { %1786 = vpow2.f32 %v1623_v12 }
 0x62b   :  { %1788 = vpow2.f32 %v1624_v15 }
 0x62c   :  { %1790 = vtanh.f32 %v1251_v46 }
 0x633   :  { %v1785_v35 = vpop.eup %1784 }
 0x634   :  { %v1787_v36 = vpop.eup %1786  ;;  %v1256_v37 = vadd.f32 1.0, %v1785_v35 }
 0x635   :  { %v1262_v41 = vadd.f32 1.0, %v1787_v36  ;;  %v1789_v42 = vpop.eup %1788 }
 0x636   :  { %1792 = vrcp.f32 %v1256_v37  ;;  %v1791_v62 = vpop.eup %1790  ;;  %v1269_v7 = vadd.f32 1.0, %v1789_v42 }
 0x637   :  { %1794 = vrcp.f32 %v1262_v41 }
 0x638   :  { %1796 = vrcp.f32 %v1269_v7 }
 0x640   :  { %v1793_v56 = vpop.eup %1792 }
 0x641   :  { %v1795_v5 = vpop.eup %1794  ;;  %v1273_v39 = vmul.f32 %v1793_v56, %v1791_v62 }
 0x642   :  { %v1272_v14 = vmul.f32 %v1795_v5, %v2440_v57  ;;  %v1797_v51 = vpop.eup %1796  ;;  %v1857_v57 = vld [vmem:[#allocation5 + $0xac] ss:$16 sps:$4 sm:$0xff]  }
 0x644   :  { %v2526_v52 = vadd.f32 %v1273_v39, %v1272_v14 }
 0x646   :  { %1798 = vtanh.f32 %v2526_v52 }
 0x650   :  { %v1799_v4 = vpop.eup %1798 }
 0x651   :  { %v1276_v49 = vmul.f32 %v1799_v4, %v1797_v51 }
 0x653   :  { %v1284_v21 = vpack.c.bf16 %v1276_v49, %v1276_v49 }
 0x655   :  { %1318 = vmatmul.mubr.bf16.vlgmr.msra.gmra.mrb[40].mxu1 %v1284_v21  ;;  %1359 = vmatmul.mubr.bf16.vlgmr.msra.gmra.mrb[44].mxu0 %v1284_v21 }
 0x656   :  { %1404 = vmatpush1.bf16.msra.mxu1 %v2443_v63  ;;  %1445 = vmatpush1.bf16.msra.mxu0 %v2446_v53  ;;  %v1862_v63 = vld [vmem:[#allocation5 + $0xe0] ss:$16 sps:$4 sm:$0xff]   ;;  %v1863_v53 = vld [vmem:[#allocation5 + $0xe8] ss:$16 sps:$4 sm:$0xff]  }
 0x657   :  { %1405 = vmatprep.subr.bf16.mxu1 %v2449_v60  ;;  %1446 = vmatprep.subr.bf16.mxu0 %v2452_v9 }
 0x658   :  { %1435 = vmatprep.mubr.bf16.mxu1 %v2613_v59  ;;  %1476 = vmatprep.mubr.bf16.mxu0 %v2613_v59  ;;  %v1856_v59 = vld [vmem:[#allocation5 + $0x88] ss:$16 sps:$4 sm:$0xff]  }
 0x65a   :  { %1406 = vmatpush1.bf16.msra.mxu1 %v2457_v10  ;;  %1447 = vmatpush1.bf16.msra.mxu0 %v2460_v30  ;;  %v2624_v10 = vld [vmem:[#allocation23_spill] sm:$0xff] }
 0x65b   :  { %1407 = vmatprep.subr.bf16.mxu1 %v2463_v61  ;;  %1448 = vmatprep.subr.bf16.mxu0 %v2466_v11  ;;  %v2625_v61 = vld [vmem:[#allocation28_spill] sm:$0xff] }
 0x65e   :  { %1408 = vmatpush1.bf16.msra.mxu1 %v2469_v3  ;;  %1449 = vmatpush1.bf16.msra.mxu0 %v2472_v13 }
 0x65f   :  { %1409 = vmatprep.subr.bf16.mxu1 %v2475_v6  ;;  %1450 = vmatprep.subr.bf16.mxu0 %v2478_v1  ;;  %v2626_v6 = vld [vmem:[#allocation25_spill] sm:$0xff] }
 0x662   :  { %1410 = vmatpush1.bf16.msra.mxu1 %v2481_v2  ;;  %1451 = vmatpush1.bf16.msra.mxu0 %v2484_v17 }
 0x663   :  { %1411 = vmatprep.subr.bf16.mxu1 %v2487_v0  ;;  %1452 = vmatprep.subr.bf16.mxu0 %v2490_v18 }
 0x666   :  { %1412 = vmatpush1.bf16.msra.mxu1 %v2493_v19  ;;  %1453 = vmatpush1.bf16.msra.mxu0 %v1856_v59 }
 0x667   :  { %1413 = vmatprep.subr.bf16.mxu1 %v2497_v20  ;;  %1454 = vmatprep.subr.bf16.mxu0 %v1857_v57 }
 0x66a   :  { %1414 = vmatpush1.bf16.msra.mxu1 %v2501_v22  ;;  %1455 = vmatpush1.bf16.msra.mxu0 %v1858_v50 }
 0x66b   :  { %1415 = vmatprep.subr.bf16.mxu1 %v2505_v23  ;;  %1456 = vmatprep.subr.bf16.mxu0 %v1859_v8 }
 0x66e   :  { %1416 = vmatpush1.bf16.msra.mxu1 %v2509_v24  ;;  %1457 = vmatpush1.bf16.msra.mxu0 %v1860_v16 }
 0x66f   :  { %1417 = vmatprep.subr.bf16.mxu1 %v2513_v38  ;;  %1458 = vmatprep.subr.bf16.mxu0 %v1861_v58 }
 0x672   :  { %1418 = vmatpush1.bf16.msra.mxu1 %v1862_v63  ;;  %1459 = vmatpush1.bf16.msra.mxu0 %v1863_v53 }
 0x728   :  { %v1319_v60 = vpop.f32.mrb[40].mxu1  ;;  %v1360_v9 = vpop.f32.mrb[44].mxu0 }
 0x729   :  { %v1367_v30 = vadd.f32 %v1319_v60, %v2624_v10  ;;  %v1369_v11 = vadd.f32 %v1360_v9, %v2625_v61  ;;  %v1321_v3 = vpop.f32.mrb[41].mxu1  ;;  %v1362_v13 = vpop.f32.mrb[45].mxu0 }
 0x72a   :  { %v1368_v1 = vadd.f32 %v1321_v3, %v2626_v6  ;;  %v1370_v2 = vadd.f32 %v1362_v13, %v2256_v55  ;;  %v1323_v17 = vpop.f32.mrb[42].mxu1  ;;  %v1364_v0 = vpop.f32.mrb[46].mxu0 }
 0x72b   :  { %v1625_v18 = vmul.f32 -1.442695, %v1367_v30  ;;  %v1324_v19 = vpop.f32.mrb[43].mxu1  ;;  %v1365_v20 = vpop.f32.mrb[47].mxu0 }
 0x72c   :  { %v1626_v22 = vmul.f32 -1.442695, %v1368_v1  ;;  %v1627_v23 = vmul.f32 -1.442695, %v1370_v2 }
 0x72d   :  { %1800 = vpow2.f32 %v1625_v18 }
 0x72e   :  { %1802 = vpow2.f32 %v1626_v22 }
 0x72f   :  { %1804 = vpow2.f32 %v1627_v23 }
 0x730   :  { %1806 = vtanh.f32 %v1369_v11 }
 0x737   :  { %v1801_v24 = vpop.eup %1800 }
 0x738   :  { %v1803_v38 = vpop.eup %1802  ;;  %v1374_v40 = vadd.f32 1.0, %v1801_v24 }
 0x739   :  { %v1380_v43 = vadd.f32 1.0, %v1803_v38  ;;  %v1805_v44 = vpop.eup %1804 }
 0x73a   :  { %1808 = vrcp.f32 %v1374_v40  ;;  %v1807_v25 = vpop.eup %1806  ;;  %v1387_v27 = vadd.f32 1.0, %v1805_v44 }
 0x73b   :  { %1810 = vrcp.f32 %v1380_v43 }
 0x73c   :  { %1812 = vrcp.f32 %v1387_v27 }
 0x744   :  { %v1809_v55 = vpop.eup %1808 }
 0x745   :  { %v1811_v26 = vpop.eup %1810  ;;  %v1391_v46 = vmul.f32 %v1809_v55, %v1807_v25 }
 0x746   :  { %v1390_v28 = vmul.f32 %v1811_v26, %v2526_v52  ;;  %v1813_v31 = vpop.eup %1812 }
 0x748   :  { %v1392_v29 = vadd.f32 %v1391_v46, %v1390_v28 }
 0x74a   :  { %1814 = vtanh.f32 %v1392_v29 }
 0x754   :  { %v1815_v47 = vpop.eup %1814 }
 0x755   :  { %v1394_v32 = vmul.f32 %v1815_v47, %v1813_v31 }
 0x757   :  { %v1402_v45 = vpack.c.bf16 %v1394_v32, %v1394_v32 }
 0x759   :  { %1436 = vmatmul.mubr.bf16.vlgmr.msra.gmra.mrb[44].mxu1 %v1402_v45  ;;  %1477 = vmatmul.mubr.bf16.vlgmr.msra.gmra.mrb[48].mxu0 %v1402_v45 }
 0x75a   :  { %1897 = shalt.err (!%p1894_p12)
}
 0x75b   :  { %s1898_s15 = scalar_lea.hbm %s2593_s7, 128 }
 0x75c   :  { %p1899_p13 = scmp.ne.s32.totalorder %s2593_s7, %s1898_s15  ;;  %p1902_p0 = scmp.lt.u32.totalorder %s1898_s15, %s2593_s7 }
 0x75e   :  { %p1904_p1 = pnand %p1902_p0, %p1899_p13 }
 0x760   :  { %1907 = shalt.err (!%p1904_p1)
}
 0x761   :  { %1528 = dma.vmem_to_hbm [thread:$0]  %s1526_s6, 128, %s2593_s7, [#allocation7]   ;;  %v2627_v34 = vld [vmem:[#allocation26_spill] sm:$0xff]  ;;  %v2628_v37 = vld [vmem:[#allocation27_spill] sm:$0xff]  ;;  %v2629_v42 = vld [vmem:[#allocation29_spill] sm:$0xff] }
 0x762   :  { %s1944_s7 = smov [#allocation9]  }
 0x763   :  { %s1535_s22 = sshll.u32 %s1944_s7, 4  ;;  %s1536_s22 = int_to_ptr.vmem [resolvable:$true] %s1535_s22 }
 0x764   :  { %s1908_s5 = scalar_lea.vmem %s1536_s22, 128  ;;  %p1913_p3 = scmp.lt.s32.totalorder %s1536_s22, %s1536_s22 }
 0x765   :  { %p1909_p2 = scmp.ne.s32.totalorder %s1536_s22, %s1908_s5  ;;  %p1914_p4 = scmp.lt.s32.totalorder %s1908_s5, %s1908_s5 }
 0x767   :  { %p1915_p5 = por %p1914_p4, %p1913_p3 }
 0x769   :  { %p1916_p6 = pnand %p1915_p5, %p1909_p2 }
 0x82c   :  { %v1437_v33 = vpop.f32.mrb[44].mxu1  ;;  %v1478_v48 = vpop.f32.mrb[48].mxu0 }
 0x82d   :  { %v1485_v12 = vadd.f32 %v1437_v33, %v2627_v34  ;;  %v1487_v15 = vadd.f32 %v1478_v48, %v2259_v54  ;;  %v1439_v35 = vpop.f32.mrb[45].mxu1  ;;  %v1480_v36 = vpop.f32.mrb[49].mxu0 }
 0x82e   :  { %v1486_v41 = vadd.f32 %v1439_v35, %v2628_v37  ;;  %v1488_v62 = vadd.f32 %v1480_v36, %v2629_v42  ;;  %v1441_v56 = vpop.f32.mrb[46].mxu1  ;;  %v1482_v5 = vpop.f32.mrb[50].mxu0 }
 0x82f   :  { %v1628_v39 = vmul.f32 -1.442695, %v1485_v12  ;;  %v1442_v7 = vpop.f32.mrb[47].mxu1  ;;  %v1483_v14 = vpop.f32.mrb[51].mxu0 }
 0x830   :  { %v1629_v52 = vmul.f32 -1.442695, %v1486_v41  ;;  %v1630_v51 = vmul.f32 -1.442695, %v1488_v62 }
 0x831   :  { %1816 = vpow2.f32 %v1628_v39 }
 0x832   :  { %1818 = vpow2.f32 %v1629_v52 }
 0x833   :  { %1820 = vpow2.f32 %v1630_v51 }
 0x834   :  { %1822 = vtanh.f32 %v1487_v15 }
 0x83b   :  { %v1817_v4 = vpop.eup %1816 }
 0x83c   :  { %v1819_v49 = vpop.eup %1818  ;;  %v1492_v21 = vadd.f32 1.0, %v1817_v4 }
 0x83d   :  { %v1498_v54 = vadd.f32 1.0, %v1819_v49  ;;  %v1821_v59 = vpop.eup %1820 }
 0x83e   :  { %1824 = vrcp.f32 %v1492_v21  ;;  %v1823_v57 = vpop.eup %1822  ;;  %v1505_v58 = vadd.f32 1.0, %v1821_v59 }
 0x83f   :  { %1826 = vrcp.f32 %v1498_v54 }
 0x840   :  { %1828 = vrcp.f32 %v1505_v58 }
 0x848   :  { %v1825_v50 = vpop.eup %1824 }
 0x849   :  { %v1827_v8 = vpop.eup %1826  ;;  %v1509_v16 = vmul.f32 %v1825_v50, %v1823_v57 }
 0x84a   :  { %v1508_v63 = vmul.f32 %v1827_v8, %v1392_v29  ;;  %v1829_v60 = vpop.eup %1828 }
 0x84c   :  { %v1510_v53 = vadd.f32 %v1509_v16, %v1508_v63 }
 0x84e   :  { %1830 = vtanh.f32 %v1510_v53 }
 0x858   :  { %v1831_v9 = vpop.eup %1830 }
 0x859   :  { %v1512_v10 = vmul.f32 %v1831_v9, %v1829_v60 }
 0x85b   :  { %1518 = vst [vmem:[#allocation9] sm:$0xff] %v1512_v10 }
 0x85c   :  { %1919 = shalt.err (!%p1916_p6)
}
 0x85d   :  { %s1920_s24 = scalar_lea.hbm %s2594_s8, 128 }
 0x85e   :  { %p1921_p7 = scmp.ne.s32.totalorder %s2594_s8, %s1920_s24  ;;  %p1924_p8 = scmp.lt.u32.totalorder %s1920_s24, %s2594_s8 }
 0x860   :  { %p1926_p9 = pnand %p1924_p8, %p1921_p7 }
 0x862   :  { %1929 = shalt.err (!%p1926_p9)
}
 0x863   :  { %1538 = dma.vmem_to_hbm [thread:$0]  %s1536_s22, 128, %s2594_s8, [#allocation10]  }
 0x864   :  { %1932 = dma.done.wait [#allocation7], 128  }
 0x865   :  { %1933 = vsyncadd [#allocation7], 4294967168 }
 0x866   :  { %1934 = dma.done.wait [#allocation10], 128  }
 0x867   :  { %1935 = vsyncadd [#allocation10], 4294967168 }
 0x868   :  { %1545 = vsyncpa [#allocation6], 1 }
 0x869   :  { %1546 = vsyncpa [#allocation7], 1 }
 0x86a   :  { %1547 = vsyncpa [#allocation10], 1 }

</bundles_post_ra>
